<compile_context>
chip_gen: v7x
topology: tpu7x:2x2x1
jax: 0.10.0
libtpu: 0.0.40
codegen_flags: <defaults>
</compile_context>

<pallas_src>
import functools

import jax
import jax.numpy as jnp
from jax import lax
from jax.experimental import pallas as pl
from jax.experimental.pallas import tpu as pltpu


def _ndtr(x):
    # Phi(x) = 0.5*(1 + erf(x/sqrt(2))).  erf via Abramowitz-Stegun 7.1.26
    # (|err| < 1.5e-7 in f32) since erf has no native Mosaic lowering.
    z = x * 0.7071067811865476
    a = jnp.abs(z)
    t = 1.0 / (1.0 + 0.3275911 * a)
    poly = t * (0.254829592 + t * (-0.284496736 + t * (1.421413741
           + t * (-1.453152027 + t * 1.061405429))))
    erf_a = 1.0 - poly * jnp.exp(-(a * a))
    erf_z = jnp.where(z >= 0.0, erf_a, -erf_a)
    return 0.5 * (1.0 + erf_z)


def _adpstream_kernel(
        # ---- inputs (read once at kernel entry for the carried state) ----
        x_ref, mean0_ref, std0_ref,
        w_enc_ref, b_enc_ref, w_down_ref, b_down_ref,
        w_up_ref, b_up_ref, w_dec_ref, b_dec_ref,
        mem_t0_ref, mem_data0_ref, win_buf0_ref, win_cnt0_ref, win_pos0_ref,
        # ---- outputs (VMEM-resident working state; HBM-aliased with inputs) ----
        mem_t_ref, mem_data_ref, mean_ref, std_ref,
        win_buf_ref, win_cnt_ref, win_pos_ref, scal_ref,
        *, skip_threshold, gamma):
    T, in_dim = x_ref.shape
    out_dim, memory_len = mem_t0_ref.shape
    win_size = win_buf0_ref.shape[1]
    n_scal = scal_ref.shape[1]

    # ---- load carried state into the VMEM-resident output blocks ----------
    mem_t_ref[...] = mem_t0_ref[...]
    mem_data_ref[...] = mem_data0_ref[...]
    mean_ref[...] = mean0_ref[...]
    std_ref[...] = std0_ref[...]
    win_buf_ref[...] = win_buf0_ref[...]
    win_cnt_ref[...] = win_cnt0_ref[...]
    win_pos_ref[...] = win_pos0_ref[...]

    # ---- loop-invariant values: hoist once per chunk -----------------------
    w_enc = w_enc_ref[...]                 # (out_dim, in_dim)  torch layout
    b_enc = b_enc_ref[...]                 # (out_dim, 1)
    w_down = w_down_ref[...]               # (out_dim, b_dim) = torch W_down^T
    b_down = b_down_ref[...]               # (1, b_dim)
    w_up = w_up_ref[...]                   # (out_dim, b_dim)  torch layout
    b_up = b_up_ref[...]                   # (out_dim, 1)
    w_dec = w_dec_ref[...]                 # (out_dim, in_dim) = torch W_dec^T
    b_dec = b_dec_ref[...]                 # (1, in_dim)
    win_lane = lax.broadcasted_iota(jnp.int32, (1, win_size), 1)
    mem_lane = lax.broadcasted_iota(jnp.int32, (1, memory_len), 1)
    mem_lane_f = mem_lane.astype(jnp.float32)
    row_ids = lax.broadcasted_iota(jnp.int32, (memory_len, 1), 0)
    scal_lane = lax.broadcasted_iota(jnp.int32, (1, n_scal), 1)
    big = jnp.float32(1e30)
    exp_sum = 1.0 + gamma + gamma * gamma

    @pl.loop(0, T)
    def _step(t):
        # ---------------------- current state -------------------------------
        x_row = x_ref[pl.ds(t, 1), :]                  # (1, in_dim)
        mean = mean_ref[...]                           # (1, in_dim)
        std = std_ref[...]                             # (1, in_dim)
        mem_t = mem_t_ref[...]                         # (out_dim, memory_len)
        mem_data = mem_data_ref[...]                   # (memory_len, in_dim)

        # ------- normalize: new = (x - mean)/std ; new[:, std==0] = 0 -------
        std_zero = std == 0.0
        new_row = jnp.where(std_zero, 0.0,
                            (x_row - mean) / jnp.where(std_zero, 1.0, std))

        # ------- encoder / adapter / decoder as VPU mat-vecs (no MXU) -------
        # encoder: Linear(in_dim, out_dim) + Tanh (torch (out,in) layout).
        enc_col = jnp.tanh(
            jnp.sum(w_enc * new_row, axis=1, keepdims=True) + b_enc)  # (out_dim,1)
        # TODO(synk): Adapter class was not provided; assumed the standard
        # bottleneck adapter  out = in + W_up @ relu(W_down @ in + b_d) + b_u.
        h_row = jnp.maximum(
            jnp.sum(w_down * enc_col, axis=0, keepdims=True) + b_down, 0.0)  # (1,b_dim)
        up_col = jnp.sum(w_up * h_row, axis=1, keepdims=True) + b_up         # (out_dim,1)
        adapted_col = enc_col + up_col                                       # (out_dim,1)
        # decoder: Linear(out_dim, in_dim); weight passed as (out_dim,in_dim)=W^T.
        rec_row = jnp.sum(w_dec * adapted_col, axis=0, keepdims=True) + b_dec  # (1,in_dim)
        diff = rec_row - new_row
        model_loss = jnp.sum(diff * diff, axis=1, keepdims=True) * (1.0 / in_dim)

        # ------- WindowLoss stats (read BEFORE update, as in torch) ---------
        # TODO(synk): WindowLoss class was not provided; modeled as a sliding
        # window (ring buffer) of the last win_size model losses with
        # mean / sample-std / population-std over the filled portion.
        buf = win_buf_ref[...]                         # (1, win_size)
        cnt = win_cnt_ref[...]                         # (1, 1) int32
        pos = win_pos_ref[...]                         # (1, 1) int32
        n_valid = jnp.minimum(cnt, win_size)
        nf = n_valid.astype(jnp.float32)
        valid = win_lane < n_valid
        w_mean = (jnp.sum(jnp.where(valid, buf, 0.0), axis=1, keepdims=True)
                  / jnp.maximum(nf, 1.0))
        cen = jnp.where(valid, buf - w_mean, 0.0)
        ss = jnp.sum(cen * cen, axis=1, keepdims=True)
        pop_std = jnp.sqrt(ss / jnp.maximum(nf, 1.0))
        smp_std = jnp.sqrt(ss / jnp.maximum(nf - 1.0, 1.0))
        std_used = jnp.where(pop_std > 0.0, smp_std, 1.0)
        prob = _ndtr((model_loss - w_mean) / std_used)
        win_loss = (skip_threshold - prob) * (1.0 / skip_threshold) * model_loss

        # WindowLoss.update(loss_item): ring-buffer write (after stats read).
        win_buf_ref[...] = jnp.where(win_lane == pos, model_loss, buf)
        win_cnt_ref[...] = jnp.minimum(cnt + 1, win_size)
        win_pos_ref[...] = jnp.where(pos + 1 >= win_size, 0, pos + 1)

        # ------- lane-dense L1 distances + top-3 smallest --------------------
        dist = jnp.sum(jnp.abs(mem_t - adapted_col), axis=0, keepdims=True)  # (1,M)
        d1 = jnp.min(dist, axis=1, keepdims=True)
        i1_f = jnp.min(jnp.where(dist == d1, mem_lane_f, float(memory_len)),
                       axis=1, keepdims=True)
        i1 = i1_f.astype(jnp.int32)                    # (1,1) = index[0]
        dist2 = jnp.where(mem_lane == i1, big, dist)
        d2 = jnp.min(dist2, axis=1, keepdims=True)
        i2 = jnp.min(jnp.where(dist2 == d2, mem_lane_f, float(memory_len)),
                     axis=1, keepdims=True).astype(jnp.int32)
        dist3 = jnp.where(mem_lane == i2, big, dist2)
        d3 = jnp.min(dist3, axis=1, keepdims=True)
        loss_values = (d1 + gamma * d2 + (gamma * gamma) * d3) * (1.0 / exp_sum)

        # ------- conditional memory / mem_data / mean / std update ----------
        do_update = loss_values <= win_loss            # (1,1) bool
        col_hit = jnp.logical_and(mem_lane == i1, do_update)       # (1, M)
        mem_t_ref[...] = jnp.where(col_hit, adapted_col, mem_t)
        row_hit = jnp.logical_and(row_ids == i1, do_update)        # (M, 1)
        new_md = jnp.where(row_hit, x_row, mem_data)               # (M, in_dim)
        mem_data_ref[...] = new_md
        mu = jnp.sum(new_md, axis=0, keepdims=True) * (1.0 / memory_len)
        var = (jnp.sum((new_md - mu) ** 2, axis=0, keepdims=True)
               * (1.0 / (memory_len - 1)))             # sample std (ddof=1)
        mean_ref[...] = jnp.where(do_update, mu, mean)
        std_ref[...] = jnp.where(do_update, jnp.sqrt(var), std)

        loss_combined = win_loss + loss_values         # (1,1)

        # ------- per-step scalar outputs (one lane-dense 128-wide row) ------
        vals = (loss_combined, model_loss, win_loss, loss_values, prob,
                d1, i1_f, do_update.astype(jnp.float32))
        row = jnp.zeros((1, n_scal), jnp.float32)
        for j, v in enumerate(vals):
            row = jnp.where(scal_lane == j, v, row)
        scal_ref[pl.ds(t, 1), :] = row


def adpstream_forward_chunk(xs, state, *, skip_threshold, gamma):
    """Runs T = xs.shape[0] sequential AdpStream.forward() steps in a single
    fused Pallas kernel.  Returns per-step (loss_combined, model_loss) and the
    updated state.  (For a single streaming sample, pass xs of shape (1, D).)
    """
    (mean, std, mem_t, mem_data,
     w_enc, b_enc, w_down, b_down, w_up, b_up, w_dec, b_dec,
     win_buf, win_cnt, win_pos) = state
    T = xs.shape[0]
    N_SCAL = 128   # lane-dense per-step scalar row (unmasked vst)

    inputs = (xs, mean, std, w_enc, b_enc, w_down, b_down, w_up, b_up,
              w_dec, b_dec, mem_t, mem_data, win_buf, win_cnt, win_pos)

    def fullspec(shape):
        return pl.BlockSpec(shape, lambda i: (0, 0))

    out_shape = (
        jax.ShapeDtypeStruct(mem_t.shape, jnp.float32),     # 0 memory (transposed)
        jax.ShapeDtypeStruct(mem_data.shape, jnp.float32),  # 1 mem_data
        jax.ShapeDtypeStruct(mean.shape, jnp.float32),      # 2 mean
        jax.ShapeDtypeStruct(std.shape, jnp.float32),       # 3 std
        jax.ShapeDtypeStruct(win_buf.shape, jnp.float32),   # 4 window buffer
        jax.ShapeDtypeStruct(win_cnt.shape, jnp.int32),     # 5 window count
        jax.ShapeDtypeStruct(win_pos.shape, jnp.int32),     # 6 window write pos
        jax.ShapeDtypeStruct((T, N_SCAL), jnp.float32),     # 7 per-step scalars
    )
    out_specs = tuple(fullspec(s.shape) for s in out_shape)

    kernel = functools.partial(_adpstream_kernel,
                               skip_threshold=float(skip_threshold),
                               gamma=float(gamma))

    outs = pl.pallas_call(
        kernel,
        grid=(1,),
        in_specs=[fullspec(a.shape) for a in inputs],
        out_specs=out_specs,
        out_shape=out_shape,
        # Carried state buffers are updated in place.
        input_output_aliases={11: 0, 12: 1, 1: 2, 2: 3, 13: 4, 14: 5, 15: 6},
        compiler_params=pltpu.CompilerParams(
            dimension_semantics=("arbitrary",)),  # sequential recurrence
    )(*inputs)

    (mem_t_n, mem_data_n, mean_n, std_n,
     win_buf_n, win_cnt_n, win_pos_n, scal) = outs
    new_state = (mean_n, std_n, mem_t_n, mem_data_n,
                 w_enc, b_enc, w_down, b_down, w_up, b_up, w_dec, b_dec,
                 win_buf_n, win_cnt_n, win_pos_n)
    return (scal[:, 0], scal[:, 1]), new_state


if __name__ == "__main__":
    # Small shapes consistent with the MemStream / AdpStream construction.
    in_dim = 40                    # feature dimension of a streaming sample
    dim = 5                        # params['dim']
    out_dim = in_dim // dim        # encoder output dim = 8
    b_dim = 32                     # params['b_dim'] (adapter bottleneck)
    memory_len = 64                # params['memory_len'] (small for demo)
    win_size = 50                  # params['win_size']
    T = 8                          # streaming samples per fused chunk
    skip_threshold = 1.0
    gamma = 0.5

    key = jax.random.PRNGKey(0)
    ks = jax.random.split(key, 12)

    xs = jax.random.normal(ks[0], (T, in_dim), dtype=jnp.float32)
    memory = jax.random.normal(ks[1], (memory_len, out_dim), dtype=jnp.float32)
    mem_data = jax.random.normal(ks[2], (memory_len, in_dim), dtype=jnp.float32)
    mem_t = jnp.asarray(memory.T)          # lane-dense (out_dim, memory_len)

    # Synthetic parameters in kernel-friendly layouts (see kernel comments):
    #  w_enc / w_up: torch (out_features, in_features); w_down / w_dec: torch W^T.
    w_enc = 0.1 * jax.random.normal(ks[3], (out_dim, in_dim), dtype=jnp.float32)
    b_enc = 0.1 * jax.random.normal(ks[4], (out_dim, 1), dtype=jnp.float32)
    w_down = 0.1 * jax.random.normal(ks[5], (out_dim, b_dim), dtype=jnp.float32)
    b_down = 0.1 * jax.random.normal(ks[6], (1, b_dim), dtype=jnp.float32)
    w_up = 0.1 * jax.random.normal(ks[7], (out_dim, b_dim), dtype=jnp.float32)
    b_up = 0.1 * jax.random.normal(ks[8], (out_dim, 1), dtype=jnp.float32)
    w_dec = 0.1 * jax.random.normal(ks[9], (out_dim, in_dim), dtype=jnp.float32)
    b_dec = 0.1 * jax.random.normal(ks[10], (1, in_dim), dtype=jnp.float32)

    mean = jnp.mean(mem_data, axis=0, keepdims=True)
    std = jnp.std(mem_data, axis=0, ddof=1, keepdims=True)

    # WindowLoss state: ring buffer of the last win_size model losses.
    win_buf = jnp.zeros((1, win_size), dtype=jnp.float32)
    win_cnt = jnp.zeros((1, 1), dtype=jnp.int32)
    win_pos = jnp.zeros((1, 1), dtype=jnp.int32)

    state = (mean, std, mem_t, mem_data,
             w_enc, b_enc, w_down, b_down, w_up, b_up, w_dec, b_dec,
             win_buf, win_cnt, win_pos)

    step = jax.jit(functools.partial(adpstream_forward_chunk,
                                     skip_threshold=skip_threshold,
                                     gamma=gamma))
    (loss_combined, model_loss), new_state = step(xs, state)
    jax.block_until_ready((loss_combined, model_loss, new_state))
    # Second chunk exercises state carry (memory / mean / std / window stats).
    (loss_combined2, model_loss2), new_state = step(xs + 0.1, new_state)
    jax.block_until_ready((loss_combined2, model_loss2, new_state))
    print("KERNEL_OK")
</pallas_src>

<mosaic_0001>
module attributes {stable_mosaic.version = 11 : i64} {
  func.func @_adpstream_kernel(%arg0: i32, %arg1: memref<8x40xf32, #tpu.memory_space<vmem>>, %arg2: memref<1x40xf32, #tpu.memory_space<vmem>>, %arg3: memref<1x40xf32, #tpu.memory_space<vmem>>, %arg4: memref<8x40xf32, #tpu.memory_space<vmem>>, %arg5: memref<8x1xf32, #tpu.memory_space<vmem>>, %arg6: memref<8x32xf32, #tpu.memory_space<vmem>>, %arg7: memref<1x32xf32, #tpu.memory_space<vmem>>, %arg8: memref<8x32xf32, #tpu.memory_space<vmem>>, %arg9: memref<8x1xf32, #tpu.memory_space<vmem>>, %arg10: memref<8x40xf32, #tpu.memory_space<vmem>>, %arg11: memref<1x40xf32, #tpu.memory_space<vmem>>, %arg12: memref<8x64xf32, #tpu.memory_space<vmem>>, %arg13: memref<64x40xf32, #tpu.memory_space<vmem>>, %arg14: memref<1x50xf32, #tpu.memory_space<vmem>>, %arg15: memref<1x1xi32, #tpu.memory_space<vmem>>, %arg16: memref<1x1xi32, #tpu.memory_space<vmem>>, %arg17: memref<8x64xf32, #tpu.memory_space<vmem>>, %arg18: memref<64x40xf32, #tpu.memory_space<vmem>>, %arg19: memref<1x40xf32, #tpu.memory_space<vmem>>, %arg20: memref<1x40xf32, #tpu.memory_space<vmem>>, %arg21: memref<1x50xf32, #tpu.memory_space<vmem>>, %arg22: memref<1x1xi32, #tpu.memory_space<vmem>>, %arg23: memref<1x1xi32, #tpu.memory_space<vmem>>, %arg24: memref<8x128xf32, #tpu.memory_space<vmem>>) attributes {dimension_semantics = [#tpu.dimension_semantics<arbitrary>], iteration_bounds = array<i64: 1>, scalar_prefetch = 0 : i64, scratch_operands = 0 : i64, tpu.core_type = #tpu.core_type<tc>, window_params = [{pipeline_mode = #tpu.pipeline_mode<synchronous>, transform_indices = @transform_0, window_bounds = array<i64: 8, 40>}, {pipeline_mode = #tpu.pipeline_mode<synchronous>, transform_indices = @transform_1, window_bounds = array<i64: 1, 40>}, {pipeline_mode = #tpu.pipeline_mode<synchronous>, transform_indices = @transform_2, window_bounds = array<i64: 1, 40>}, {pipeline_mode = #tpu.pipeline_mode<synchronous>, transform_indices = @transform_3, window_bounds = array<i64: 8, 40>}, {pipeline_mode = #tpu.pipeline_mode<synchronous>, transform_indices = @transform_4, window_bounds = array<i64: 8, 1>}, {pipeline_mode = #tpu.pipeline_mode<synchronous>, transform_indices = @transform_5, window_bounds = array<i64: 8, 32>}, {pipeline_mode = #tpu.pipeline_mode<synchronous>, transform_indices = @transform_6, window_bounds = array<i64: 1, 32>}, {pipeline_mode = #tpu.pipeline_mode<synchronous>, transform_indices = @transform_7, window_bounds = array<i64: 8, 32>}, {pipeline_mode = #tpu.pipeline_mode<synchronous>, transform_indices = @transform_8, window_bounds = array<i64: 8, 1>}, {pipeline_mode = #tpu.pipeline_mode<synchronous>, transform_indices = @transform_9, window_bounds = array<i64: 8, 40>}, {pipeline_mode = #tpu.pipeline_mode<synchronous>, transform_indices = @transform_10, window_bounds = array<i64: 1, 40>}, {pipeline_mode = #tpu.pipeline_mode<synchronous>, transform_indices = @transform_11, window_bounds = array<i64: 8, 64>}, {pipeline_mode = #tpu.pipeline_mode<synchronous>, transform_indices = @transform_12, window_bounds = array<i64: 64, 40>}, {pipeline_mode = #tpu.pipeline_mode<synchronous>, transform_indices = @transform_13, window_bounds = array<i64: 1, 50>}, {pipeline_mode = #tpu.pipeline_mode<synchronous>, transform_indices = @transform_14, window_bounds = array<i64: 1, 1>}, {pipeline_mode = #tpu.pipeline_mode<synchronous>, transform_indices = @transform_15, window_bounds = array<i64: 1, 1>}, {pipeline_mode = #tpu.pipeline_mode<synchronous>, transform_indices = @transform_16, window_bounds = array<i64: 8, 64>}, {pipeline_mode = #tpu.pipeline_mode<synchronous>, transform_indices = @transform_17, window_bounds = array<i64: 64, 40>}, {pipeline_mode = #tpu.pipeline_mode<synchronous>, transform_indices = @transform_18, window_bounds = array<i64: 1, 40>}, {pipeline_mode = #tpu.pipeline_mode<synchronous>, transform_indices = @transform_19, window_bounds = array<i64: 1, 40>}, {pipeline_mode = #tpu.pipeline_mode<synchronous>, transform_indices = @transform_20, window_bounds = array<i64: 1, 50>}, {pipeline_mode = #tpu.pipeline_mode<synchronous>, transform_indices = @transform_21, window_bounds = array<i64: 1, 1>}, {pipeline_mode = #tpu.pipeline_mode<synchronous>, transform_indices = @transform_22, window_bounds = array<i64: 1, 1>}, {pipeline_mode = #tpu.pipeline_mode<synchronous>, transform_indices = @transform_23, window_bounds = array<i64: 8, 128>}]} {
    %c0 = arith.constant 0 : index
    %c0_0 = arith.constant 0 : index
    %0 = vector.load %arg12[%c0, %c0_0] : memref<8x64xf32, #tpu.memory_space<vmem>>, vector<8x64xf32>
    %c0_1 = arith.constant 0 : index
    %c0_2 = arith.constant 0 : index
    %1 = vector.load %arg17[%c0_1, %c0_2] : memref<8x64xf32, #tpu.memory_space<vmem>>, vector<8x64xf32>
    tpu.vector_store %arg17[%c0_1, %c0_2], %0 {strides = array<i32>} : memref<8x64xf32, #tpu.memory_space<vmem>>, vector<8x64xf32>,
    %c0_3 = arith.constant 0 : index
    %c0_4 = arith.constant 0 : index
    %2 = vector.load %arg13[%c0_3, %c0_4] : memref<64x40xf32, #tpu.memory_space<vmem>>, vector<64x40xf32>
    %c0_5 = arith.constant 0 : index
    %c0_6 = arith.constant 0 : index
    %3 = vector.load %arg18[%c0_5, %c0_6] : memref<64x40xf32, #tpu.memory_space<vmem>>, vector<64x40xf32>
    tpu.vector_store %arg18[%c0_5, %c0_6], %2 {strides = array<i32>} : memref<64x40xf32, #tpu.memory_space<vmem>>, vector<64x40xf32>,
    %c0_7 = arith.constant 0 : index
    %c0_8 = arith.constant 0 : index
    %4 = vector.load %arg2[%c0_7, %c0_8] : memref<1x40xf32, #tpu.memory_space<vmem>>, vector<1x40xf32>
    %c0_9 = arith.constant 0 : index
    %c0_10 = arith.constant 0 : index
    %5 = vector.load %arg19[%c0_9, %c0_10] : memref<1x40xf32, #tpu.memory_space<vmem>>, vector<1x40xf32>
    tpu.vector_store %arg19[%c0_9, %c0_10], %4 {strides = array<i32>} : memref<1x40xf32, #tpu.memory_space<vmem>>, vector<1x40xf32>,
    %c0_11 = arith.constant 0 : index
    %c0_12 = arith.constant 0 : index
    %6 = vector.load %arg3[%c0_11, %c0_12] : memref<1x40xf32, #tpu.memory_space<vmem>>, vector<1x40xf32>
    %c0_13 = arith.constant 0 : index
    %c0_14 = arith.constant 0 : index
    %7 = vector.load %arg20[%c0_13, %c0_14] : memref<1x40xf32, #tpu.memory_space<vmem>>, vector<1x40xf32>
    tpu.vector_store %arg20[%c0_13, %c0_14], %6 {strides = array<i32>} : memref<1x40xf32, #tpu.memory_space<vmem>>, vector<1x40xf32>,
    %c0_15 = arith.constant 0 : index
    %c0_16 = arith.constant 0 : index
    %8 = vector.load %arg14[%c0_15, %c0_16] : memref<1x50xf32, #tpu.memory_space<vmem>>, vector<1x50xf32>
    %c0_17 = arith.constant 0 : index
    %c0_18 = arith.constant 0 : index
    %9 = vector.load %arg21[%c0_17, %c0_18] : memref<1x50xf32, #tpu.memory_space<vmem>>, vector<1x50xf32>
    tpu.vector_store %arg21[%c0_17, %c0_18], %8 {strides = array<i32>} : memref<1x50xf32, #tpu.memory_space<vmem>>, vector<1x50xf32>,
    %c0_19 = arith.constant 0 : index
    %c0_20 = arith.constant 0 : index
    %10 = vector.load %arg15[%c0_19, %c0_20] : memref<1x1xi32, #tpu.memory_space<vmem>>, vector<1x1xi32>
    %c0_21 = arith.constant 0 : index
    %c0_22 = arith.constant 0 : index
    %11 = vector.load %arg22[%c0_21, %c0_22] : memref<1x1xi32, #tpu.memory_space<vmem>>, vector<1x1xi32>
    tpu.vector_store %arg22[%c0_21, %c0_22], %10 {strides = array<i32>} : memref<1x1xi32, #tpu.memory_space<vmem>>, vector<1x1xi32>,
    %c0_23 = arith.constant 0 : index
    %c0_24 = arith.constant 0 : index
    %12 = vector.load %arg16[%c0_23, %c0_24] : memref<1x1xi32, #tpu.memory_space<vmem>>, vector<1x1xi32>
    %c0_25 = arith.constant 0 : index
    %c0_26 = arith.constant 0 : index
    %13 = vector.load %arg23[%c0_25, %c0_26] : memref<1x1xi32, #tpu.memory_space<vmem>>, vector<1x1xi32>
    tpu.vector_store %arg23[%c0_25, %c0_26], %12 {strides = array<i32>} : memref<1x1xi32, #tpu.memory_space<vmem>>, vector<1x1xi32>,
    %c0_27 = arith.constant 0 : index
    %c0_28 = arith.constant 0 : index
    %14 = vector.load %arg4[%c0_27, %c0_28] : memref<8x40xf32, #tpu.memory_space<vmem>>, vector<8x40xf32>
    %c0_29 = arith.constant 0 : index
    %c0_30 = arith.constant 0 : index
    %15 = vector.load %arg5[%c0_29, %c0_30] : memref<8x1xf32, #tpu.memory_space<vmem>>, vector<8x1xf32>
    %c0_31 = arith.constant 0 : index
    %c0_32 = arith.constant 0 : index
    %16 = vector.load %arg6[%c0_31, %c0_32] : memref<8x32xf32, #tpu.memory_space<vmem>>, vector<8x32xf32>
    %c0_33 = arith.constant 0 : index
    %c0_34 = arith.constant 0 : index
    %17 = vector.load %arg7[%c0_33, %c0_34] : memref<1x32xf32, #tpu.memory_space<vmem>>, vector<1x32xf32>
    %c0_35 = arith.constant 0 : index
    %c0_36 = arith.constant 0 : index
    %18 = vector.load %arg8[%c0_35, %c0_36] : memref<8x32xf32, #tpu.memory_space<vmem>>, vector<8x32xf32>
    %c0_37 = arith.constant 0 : index
    %c0_38 = arith.constant 0 : index
    %19 = vector.load %arg9[%c0_37, %c0_38] : memref<8x1xf32, #tpu.memory_space<vmem>>, vector<8x1xf32>
    %c0_39 = arith.constant 0 : index
    %c0_40 = arith.constant 0 : index
    %20 = vector.load %arg10[%c0_39, %c0_40] : memref<8x40xf32, #tpu.memory_space<vmem>>, vector<8x40xf32>
    %c0_41 = arith.constant 0 : index
    %c0_42 = arith.constant 0 : index
    %21 = vector.load %arg11[%c0_41, %c0_42] : memref<1x40xf32, #tpu.memory_space<vmem>>, vector<1x40xf32>
    %22 = tpu.iota {dimensions = array<i32: 1>} : vector<1x50xi32>
    %23 = tpu.iota {dimensions = array<i32: 1>} : vector<1x64xi32>
    %24 = arith.sitofp %23 : vector<1x64xi32> to vector<1x64xf32>
    %25 = tpu.iota {dimensions = array<i32: 0>} : vector<64x1xi32>
    %26 = tpu.iota {dimensions = array<i32: 1>} : vector<1x128xi32>
    %cst = arith.constant 1.000000e+30 : f32
    %c0_i32 = arith.constant 0 : i32
    %c8_i32 = arith.constant 8 : i32
    %27 = arith.addi %c0_i32, %c8_i32 : i32
    %c1_i32 = arith.constant 1 : i32
    scf.for %arg25 = %c0_i32 to %27 step %c1_i32  : i32 {
      %c1_i32_44 = arith.constant 1 : i32
      %28 = arith.muli %arg25, %c1_i32_44 : i32
      %c0_i32_45 = arith.constant 0 : i32
      %29 = arith.addi %c0_i32_45, %28 : i32
      %30 = arith.index_cast %29 : i32 to index
      %c0_46 = arith.constant 0 : index
      %31 = vector.load %arg1[%30, %c0_46] : memref<8x40xf32, #tpu.memory_space<vmem>>, vector<1x40xf32>
      %c0_47 = arith.constant 0 : index
      %c0_48 = arith.constant 0 : index
      %32 = vector.load %arg19[%c0_47, %c0_48] : memref<1x40xf32, #tpu.memory_space<vmem>>, vector<1x40xf32>
      %c0_49 = arith.constant 0 : index
      %c0_50 = arith.constant 0 : index
      %33 = vector.load %arg20[%c0_49, %c0_50] : memref<1x40xf32, #tpu.memory_space<vmem>>, vector<1x40xf32>
      %c0_51 = arith.constant 0 : index
      %c0_52 = arith.constant 0 : index
      %34 = vector.load %arg17[%c0_51, %c0_52] : memref<8x64xf32, #tpu.memory_space<vmem>>, vector<8x64xf32>
      %c0_53 = arith.constant 0 : index
      %c0_54 = arith.constant 0 : index
      %35 = vector.load %arg18[%c0_53, %c0_54] : memref<64x40xf32, #tpu.memory_space<vmem>>, vector<64x40xf32>
      %cst_55 = arith.constant 0.000000e+00 : f32
      %36 = vector.broadcast %cst_55 : f32 to vector<1x40xf32>
      %37 = arith.cmpf oeq, %33, %36 : vector<1x40xf32>
      %38 = arith.subf %31, %32 : vector<1x40xf32>
      %cst_56 = arith.constant 1.000000e+00 : f32
      %39 = vector.broadcast %cst_56 : f32 to vector<1x40xf32>
      %40 = arith.select %37, %39, %33 : vector<1x40xi1>, vector<1x40xf32>
      %41 = arith.divf %38, %40 : vector<1x40xf32>
      %cst_57 = arith.constant 0.000000e+00 : f32
      %42 = vector.broadcast %cst_57 : f32 to vector<1x40xf32>
      %43 = arith.select %37, %42, %41 : vector<1x40xi1>, vector<1x40xf32>
      %44 = vector.broadcast %43 : vector<1x40xf32> to vector<8x40xf32>
      %45 = arith.mulf %14, %44 : vector<8x40xf32>
      %cst_58 = arith.constant dense<0.000000e+00> : vector<8xf32>
      %46 = vector.multi_reduction <add>, %45, %cst_58 [1] : vector<8x40xf32> to vector<8xf32>
      %47 = vector.shape_cast %46 : vector<8xf32> to vector<8x1xf32>
      %48 = arith.addf %47, %15 : vector<8x1xf32>
      %49 = math.tanh %48 : vector<8x1xf32>
      %50 = vector.broadcast %49 : vector<8x1xf32> to vector<8x32xf32>
      %51 = arith.mulf %16, %50 : vector<8x32xf32>
      %cst_59 = arith.constant dense<0.000000e+00> : vector<32xf32>
      %52 = vector.multi_reduction <add>, %51, %cst_59 [0] : vector<8x32xf32> to vector<32xf32>
      %53 = vector.shape_cast %52 : vector<32xf32> to vector<1x32xf32>
      %54 = arith.addf %53, %17 : vector<1x32xf32>
      %cst_60 = arith.constant 0.000000e+00 : f32
      %55 = vector.broadcast %cst_60 : f32 to vector<1x32xf32>
      %56 = arith.maximumf %54, %55 : vector<1x32xf32>
      %57 = vector.broadcast %56 : vector<1x32xf32> to vector<8x32xf32>
      %58 = arith.mulf %18, %57 : vector<8x32xf32>
      %cst_61 = arith.constant dense<0.000000e+00> : vector<8xf32>
      %59 = vector.multi_reduction <add>, %58, %cst_61 [1] : vector<8x32xf32> to vector<8xf32>
      %60 = vector.shape_cast %59 : vector<8xf32> to vector<8x1xf32>
      %61 = arith.addf %60, %19 : vector<8x1xf32>
      %62 = arith.addf %49, %61 : vector<8x1xf32>
      %63 = vector.broadcast %62 : vector<8x1xf32> to vector<8x40xf32>
      %64 = arith.mulf %20, %63 : vector<8x40xf32>
      %cst_62 = arith.constant dense<0.000000e+00> : vector<40xf32>
      %65 = vector.multi_reduction <add>, %64, %cst_62 [0] : vector<8x40xf32> to vector<40xf32>
      %66 = vector.shape_cast %65 : vector<40xf32> to vector<1x40xf32>
      %67 = arith.addf %66, %21 : vector<1x40xf32>
      %68 = arith.subf %67, %43 : vector<1x40xf32>
      %69 = arith.mulf %68, %68 : vector<1x40xf32>
      %cst_63 = arith.constant dense<0.000000e+00> : vector<1xf32>
      %70 = vector.multi_reduction <add>, %69, %cst_63 [1] : vector<1x40xf32> to vector<1xf32>
      %71 = vector.shape_cast %70 : vector<1xf32> to vector<1x1xf32>
      %cst_64 = arith.constant 2.500000e-02 : f32
      %72 = vector.broadcast %cst_64 : f32 to vector<1x1xf32>
      %73 = arith.mulf %71, %72 : vector<1x1xf32>
      %c0_65 = arith.constant 0 : index
      %c0_66 = arith.constant 0 : index
      %74 = vector.load %arg21[%c0_65, %c0_66] : memref<1x50xf32, #tpu.memory_space<vmem>>, vector<1x50xf32>
      %c0_67 = arith.constant 0 : index
      %c0_68 = arith.constant 0 : index
      %75 = vector.load %arg22[%c0_67, %c0_68] : memref<1x1xi32, #tpu.memory_space<vmem>>, vector<1x1xi32>
      %c0_69 = arith.constant 0 : index
      %c0_70 = arith.constant 0 : index
      %76 = vector.load %arg23[%c0_69, %c0_70] : memref<1x1xi32, #tpu.memory_space<vmem>>, vector<1x1xi32>
      %c50_i32 = arith.constant 50 : i32
      %77 = vector.broadcast %c50_i32 : i32 to vector<1x1xi32>
      %78 = arith.minsi %75, %77 : vector<1x1xi32>
      %79 = arith.sitofp %78 : vector<1x1xi32> to vector<1x1xf32>
      %80 = vector.broadcast %78 : vector<1x1xi32> to vector<1x50xi32>
      %81 = arith.cmpi slt, %22, %80 : vector<1x50xi32>
      %cst_71 = arith.constant 0.000000e+00 : f32
      %82 = vector.broadcast %cst_71 : f32 to vector<1x50xf32>
      %83 = arith.select %81, %74, %82 : vector<1x50xi1>, vector<1x50xf32>
      %cst_72 = arith.constant dense<0.000000e+00> : vector<1xf32>
      %84 = vector.multi_reduction <add>, %83, %cst_72 [1] : vector<1x50xf32> to vector<1xf32>
      %85 = vector.shape_cast %84 : vector<1xf32> to vector<1x1xf32>
      %cst_73 = arith.constant 1.000000e+00 : f32
      %86 = vector.broadcast %cst_73 : f32 to vector<1x1xf32>
      %87 = arith.maximumf %79, %86 : vector<1x1xf32>
      %88 = arith.divf %85, %87 : vector<1x1xf32>
      %89 = vector.broadcast %88 : vector<1x1xf32> to vector<1x50xf32>
      %90 = arith.subf %74, %89 : vector<1x50xf32>
      %cst_74 = arith.constant 0.000000e+00 : f32
      %91 = vector.broadcast %cst_74 : f32 to vector<1x50xf32>
      %92 = arith.select %81, %90, %91 : vector<1x50xi1>, vector<1x50xf32>
      %93 = arith.mulf %92, %92 : vector<1x50xf32>
      %cst_75 = arith.constant dense<0.000000e+00> : vector<1xf32>
      %94 = vector.multi_reduction <add>, %93, %cst_75 [1] : vector<1x50xf32> to vector<1xf32>
      %95 = vector.shape_cast %94 : vector<1xf32> to vector<1x1xf32>
      %cst_76 = arith.constant 1.000000e+00 : f32
      %96 = vector.broadcast %cst_76 : f32 to vector<1x1xf32>
      %97 = arith.maximumf %79, %96 : vector<1x1xf32>
      %98 = arith.divf %95, %97 : vector<1x1xf32>
      %99 = math.sqrt %98 : vector<1x1xf32>
      %cst_77 = arith.constant 1.000000e+00 : f32
      %100 = vector.broadcast %cst_77 : f32 to vector<1x1xf32>
      %101 = arith.subf %79, %100 : vector<1x1xf32>
      %cst_78 = arith.constant 1.000000e+00 : f32
      %102 = vector.broadcast %cst_78 : f32 to vector<1x1xf32>
      %103 = arith.maximumf %101, %102 : vector<1x1xf32>
      %104 = arith.divf %95, %103 : vector<1x1xf32>
      %105 = math.sqrt %104 : vector<1x1xf32>
      %cst_79 = arith.constant 0.000000e+00 : f32
      %106 = vector.broadcast %cst_79 : f32 to vector<1x1xf32>
      %107 = arith.cmpf ogt, %99, %106 : vector<1x1xf32>
      %cst_80 = arith.constant 1.000000e+00 : f32
      %108 = vector.broadcast %cst_80 : f32 to vector<1x1xf32>
      %109 = arith.select %107, %105, %108 : vector<1x1xi1>, vector<1x1xf32>
      %110 = arith.subf %73, %88 : vector<1x1xf32>
      %111 = arith.divf %110, %109 : vector<1x1xf32>
      %cst_81 = arith.constant 0.707106769 : f32
      %112 = vector.broadcast %cst_81 : f32 to vector<1x1xf32>
      %113 = arith.mulf %111, %112 : vector<1x1xf32>
      %114 = math.absf %113 : vector<1x1xf32>
      %cst_82 = arith.constant 0.327591091 : f32
      %115 = vector.broadcast %cst_82 : f32 to vector<1x1xf32>
      %116 = arith.mulf %115, %114 : vector<1x1xf32>
      %cst_83 = arith.constant 1.000000e+00 : f32
      %117 = vector.broadcast %cst_83 : f32 to vector<1x1xf32>
      %118 = arith.addf %117, %116 : vector<1x1xf32>
      %cst_84 = arith.constant 1.000000e+00 : f32
      %119 = vector.broadcast %cst_84 : f32 to vector<1x1xf32>
      %120 = arith.divf %119, %118 : vector<1x1xf32>
      %cst_85 = arith.constant 1.06140542 : f32
      %121 = vector.broadcast %cst_85 : f32 to vector<1x1xf32>
      %122 = arith.mulf %120, %121 : vector<1x1xf32>
      %cst_86 = arith.constant -1.45315206 : f32
      %123 = vector.broadcast %cst_86 : f32 to vector<1x1xf32>
      %124 = arith.addf %123, %122 : vector<1x1xf32>
      %125 = arith.mulf %120, %124 : vector<1x1xf32>
      %cst_87 = arith.constant 1.42141378 : f32
      %126 = vector.broadcast %cst_87 : f32 to vector<1x1xf32>
      %127 = arith.addf %126, %125 : vector<1x1xf32>
      %128 = arith.mulf %120, %127 : vector<1x1xf32>
      %cst_88 = arith.constant -0.284496725 : f32
      %129 = vector.broadcast %cst_88 : f32 to vector<1x1xf32>
      %130 = arith.addf %129, %128 : vector<1x1xf32>
      %131 = arith.mulf %120, %130 : vector<1x1xf32>
      %cst_89 = arith.constant 0.254829586 : f32
      %132 = vector.broadcast %cst_89 : f32 to vector<1x1xf32>
      %133 = arith.addf %132, %131 : vector<1x1xf32>
      %134 = arith.mulf %120, %133 : vector<1x1xf32>
      %135 = arith.mulf %114, %114 : vector<1x1xf32>
      %cst_90 = arith.constant 0.000000e+00 : f32
      %136 = vector.broadcast %cst_90 : f32 to vector<1x1xf32>
      %137 = arith.subf %136, %135 : vector<1x1xf32>
      %138 = math.exp %137 : vector<1x1xf32>
      %139 = arith.mulf %134, %138 : vector<1x1xf32>
      %cst_91 = arith.constant 1.000000e+00 : f32
      %140 = vector.broadcast %cst_91 : f32 to vector<1x1xf32>
      %141 = arith.subf %140, %139 : vector<1x1xf32>
      %cst_92 = arith.constant 0.000000e+00 : f32
      %142 = vector.broadcast %cst_92 : f32 to vector<1x1xf32>
      %143 = arith.cmpf oge, %113, %142 : vector<1x1xf32>
      %cst_93 = arith.constant 0.000000e+00 : f32
      %144 = vector.broadcast %cst_93 : f32 to vector<1x1xf32>
      %145 = arith.subf %144, %141 : vector<1x1xf32>
      %146 = arith.select %143, %141, %145 : vector<1x1xi1>, vector<1x1xf32>
      %cst_94 = arith.constant 1.000000e+00 : f32
      %147 = vector.broadcast %cst_94 : f32 to vector<1x1xf32>
      %148 = arith.addf %147, %146 : vector<1x1xf32>
      %cst_95 = arith.constant 5.000000e-01 : f32
      %149 = vector.broadcast %cst_95 : f32 to vector<1x1xf32>
      %150 = arith.mulf %149, %148 : vector<1x1xf32>
      %cst_96 = arith.constant 1.000000e+00 : f32
      %151 = vector.broadcast %cst_96 : f32 to vector<1x1xf32>
      %152 = arith.subf %151, %150 : vector<1x1xf32>
      %cst_97 = arith.constant 1.000000e+00 : f32
      %153 = vector.broadcast %cst_97 : f32 to vector<1x1xf32>
      %154 = arith.mulf %152, %153 : vector<1x1xf32>
      %155 = arith.mulf %154, %73 : vector<1x1xf32>
      %156 = vector.broadcast %76 : vector<1x1xi32> to vector<1x50xi32>
      %157 = arith.cmpi eq, %22, %156 : vector<1x50xi32>
      %158 = vector.shape_cast %73 : vector<1x1xf32> to vector<1x1xf32>
      %159 = vector.broadcast %158 : vector<1x1xf32> to vector<1x50xf32>
      %160 = arith.select %157, %159, %74 : vector<1x50xi1>, vector<1x50xf32>
      %c0_98 = arith.constant 0 : index
      %c0_99 = arith.constant 0 : index
      %161 = vector.load %arg21[%c0_98, %c0_99] : memref<1x50xf32, #tpu.memory_space<vmem>>, vector<1x50xf32>
      tpu.vector_store %arg21[%c0_98, %c0_99], %160 {strides = array<i32>} : memref<1x50xf32, #tpu.memory_space<vmem>>, vector<1x50xf32>,
      %c1_i32_100 = arith.constant 1 : i32
      %162 = vector.broadcast %c1_i32_100 : i32 to vector<1x1xi32>
      %163 = arith.addi %75, %162 : vector<1x1xi32>
      %c50_i32_101 = arith.constant 50 : i32
      %164 = vector.broadcast %c50_i32_101 : i32 to vector<1x1xi32>
      %165 = arith.minsi %163, %164 : vector<1x1xi32>
      %c0_102 = arith.constant 0 : index
      %c0_103 = arith.constant 0 : index
      %166 = vector.load %arg22[%c0_102, %c0_103] : memref<1x1xi32, #tpu.memory_space<vmem>>, vector<1x1xi32>
      tpu.vector_store %arg22[%c0_102, %c0_103], %165 {strides = array<i32>} : memref<1x1xi32, #tpu.memory_space<vmem>>, vector<1x1xi32>,
      %c1_i32_104 = arith.constant 1 : i32
      %167 = vector.broadcast %c1_i32_104 : i32 to vector<1x1xi32>
      %168 = arith.addi %76, %167 : vector<1x1xi32>
      %c50_i32_105 = arith.constant 50 : i32
      %169 = vector.broadcast %c50_i32_105 : i32 to vector<1x1xi32>
      %170 = arith.cmpi sge, %168, %169 : vector<1x1xi32>
      %c1_i32_106 = arith.constant 1 : i32
      %171 = vector.broadcast %c1_i32_106 : i32 to vector<1x1xi32>
      %172 = arith.addi %76, %171 : vector<1x1xi32>
      %c0_i32_107 = arith.constant 0 : i32
      %173 = vector.broadcast %c0_i32_107 : i32 to vector<1x1xi32>
      %174 = arith.select %170, %173, %172 : vector<1x1xi1>, vector<1x1xi32>
      %c0_108 = arith.constant 0 : index
      %c0_109 = arith.constant 0 : index
      %175 = vector.load %arg23[%c0_108, %c0_109] : memref<1x1xi32, #tpu.memory_space<vmem>>, vector<1x1xi32>
      tpu.vector_store %arg23[%c0_108, %c0_109], %174 {strides = array<i32>} : memref<1x1xi32, #tpu.memory_space<vmem>>, vector<1x1xi32>,
      %176 = vector.broadcast %62 : vector<8x1xf32> to vector<8x64xf32>
      %177 = arith.subf %34, %176 : vector<8x64xf32>
      %178 = math.absf %177 : vector<8x64xf32>
      %cst_110 = arith.constant dense<0.000000e+00> : vector<64xf32>
      %179 = vector.multi_reduction <add>, %178, %cst_110 [0] : vector<8x64xf32> to vector<64xf32>
      %180 = vector.shape_cast %179 : vector<64xf32> to vector<1x64xf32>
      %cst_111 = arith.constant dense<0x7F800000> : vector<1xf32>
      %181 = vector.multi_reduction <minimumf>, %180, %cst_111 [1] : vector<1x64xf32> to vector<1xf32>
      %182 = vector.shape_cast %181 : vector<1xf32> to vector<1x1xf32>
      %183 = vector.broadcast %182 : vector<1x1xf32> to vector<1x64xf32>
      %184 = arith.cmpf oeq, %180, %183 : vector<1x64xf32>
      %cst_112 = arith.constant 6.400000e+01 : f32
      %185 = vector.broadcast %cst_112 : f32 to vector<1x64xf32>
      %186 = arith.select %184, %24, %185 : vector<1x64xi1>, vector<1x64xf32>
      %cst_113 = arith.constant dense<0x7F800000> : vector<1xf32>
      %187 = vector.multi_reduction <minimumf>, %186, %cst_113 [1] : vector<1x64xf32> to vector<1xf32>
      %188 = vector.shape_cast %187 : vector<1xf32> to vector<1x1xf32>
      %189 = arith.fptosi %188 : vector<1x1xf32> to vector<1x1xi32>
      %190 = vector.broadcast %189 : vector<1x1xi32> to vector<1x64xi32>
      %191 = arith.cmpi eq, %23, %190 : vector<1x64xi32>
      %192 = vector.broadcast %cst : f32 to vector<1x64xf32>
      %193 = arith.select %191, %192, %180 : vector<1x64xi1>, vector<1x64xf32>
      %cst_114 = arith.constant dense<0x7F800000> : vector<1xf32>
      %194 = vector.multi_reduction <minimumf>, %193, %cst_114 [1] : vector<1x64xf32> to vector<1xf32>
      %195 = vector.shape_cast %194 : vector<1xf32> to vector<1x1xf32>
      %196 = vector.broadcast %195 : vector<1x1xf32> to vector<1x64xf32>
      %197 = arith.cmpf oeq, %193, %196 : vector<1x64xf32>
      %cst_115 = arith.constant 6.400000e+01 : f32
      %198 = vector.broadcast %cst_115 : f32 to vector<1x64xf32>
      %199 = arith.select %197, %24, %198 : vector<1x64xi1>, vector<1x64xf32>
      %cst_116 = arith.constant dense<0x7F800000> : vector<1xf32>
      %200 = vector.multi_reduction <minimumf>, %199, %cst_116 [1] : vector<1x64xf32> to vector<1xf32>
      %201 = vector.shape_cast %200 : vector<1xf32> to vector<1x1xf32>
      %202 = arith.fptosi %201 : vector<1x1xf32> to vector<1x1xi32>
      %203 = vector.broadcast %202 : vector<1x1xi32> to vector<1x64xi32>
      %204 = arith.cmpi eq, %23, %203 : vector<1x64xi32>
      %205 = vector.broadcast %cst : f32 to vector<1x64xf32>
      %206 = arith.select %204, %205, %193 : vector<1x64xi1>, vector<1x64xf32>
      %cst_117 = arith.constant dense<0x7F800000> : vector<1xf32>
      %207 = vector.multi_reduction <minimumf>, %206, %cst_117 [1] : vector<1x64xf32> to vector<1xf32>
      %208 = vector.shape_cast %207 : vector<1xf32> to vector<1x1xf32>
      %cst_118 = arith.constant 5.000000e-01 : f32
      %209 = vector.broadcast %cst_118 : f32 to vector<1x1xf32>
      %210 = arith.mulf %209, %195 : vector<1x1xf32>
      %211 = arith.addf %182, %210 : vector<1x1xf32>
      %cst_119 = arith.constant 2.500000e-01 : f32
      %212 = vector.broadcast %cst_119 : f32 to vector<1x1xf32>
      %213 = arith.mulf %212, %208 : vector<1x1xf32>
      %214 = arith.addf %211, %213 : vector<1x1xf32>
      %cst_120 = arith.constant 0.571428597 : f32
      %215 = vector.broadcast %cst_120 : f32 to vector<1x1xf32>
      %216 = arith.mulf %214, %215 : vector<1x1xf32>
      %217 = arith.cmpf ole, %216, %155 : vector<1x1xf32>
      %218 = vector.broadcast %189 : vector<1x1xi32> to vector<1x64xi32>
      %219 = arith.cmpi eq, %23, %218 : vector<1x64xi32>
      %220 = vector.broadcast %217 : vector<1x1xi1> to vector<1x64xi1>
      %221 = arith.andi %219, %220 : vector<1x64xi1>
      %222 = vector.shape_cast %221 : vector<1x64xi1> to vector<1x64xi1>
      %223 = vector.broadcast %222 : vector<1x64xi1> to vector<8x64xi1>
      %224 = vector.shape_cast %62 : vector<8x1xf32> to vector<8x1xf32>
      %225 = vector.broadcast %224 : vector<8x1xf32> to vector<8x64xf32>
      %226 = arith.select %223, %225, %34 : vector<8x64xi1>, vector<8x64xf32>
      %c0_121 = arith.constant 0 : index
      %c0_122 = arith.constant 0 : index
      %227 = vector.load %arg17[%c0_121, %c0_122] : memref<8x64xf32, #tpu.memory_space<vmem>>, vector<8x64xf32>
      tpu.vector_store %arg17[%c0_121, %c0_122], %226 {strides = array<i32>} : memref<8x64xf32, #tpu.memory_space<vmem>>, vector<8x64xf32>,
      %228 = vector.broadcast %189 : vector<1x1xi32> to vector<64x1xi32>
      %229 = arith.cmpi eq, %25, %228 : vector<64x1xi32>
      %230 = vector.broadcast %217 : vector<1x1xi1> to vector<64x1xi1>
      %231 = arith.andi %229, %230 : vector<64x1xi1>
      %232 = vector.shape_cast %231 : vector<64x1xi1> to vector<64x1xi1>
      %233 = vector.broadcast %232 : vector<64x1xi1> to vector<64x40xi1>
      %234 = vector.shape_cast %31 : vector<1x40xf32> to vector<1x40xf32>
      %235 = vector.broadcast %234 : vector<1x40xf32> to vector<64x40xf32>
      %236 = arith.select %233, %235, %35 : vector<64x40xi1>, vector<64x40xf32>
      %c0_123 = arith.constant 0 : index
      %c0_124 = arith.constant 0 : index
      %237 = vector.load %arg18[%c0_123, %c0_124] : memref<64x40xf32, #tpu.memory_space<vmem>>, vector<64x40xf32>
      tpu.vector_store %arg18[%c0_123, %c0_124], %236 {strides = array<i32>} : memref<64x40xf32, #tpu.memory_space<vmem>>, vector<64x40xf32>,
      %cst_125 = arith.constant dense<0.000000e+00> : vector<40xf32>
      %238 = vector.multi_reduction <add>, %236, %cst_125 [0] : vector<64x40xf32> to vector<40xf32>
      %239 = vector.shape_cast %238 : vector<40xf32> to vector<1x40xf32>
      %cst_126 = arith.constant 1.562500e-02 : f32
      %240 = vector.broadcast %cst_126 : f32 to vector<1x40xf32>
      %241 = arith.mulf %239, %240 : vector<1x40xf32>
      %242 = vector.broadcast %241 : vector<1x40xf32> to vector<64x40xf32>
      %243 = arith.subf %236, %242 : vector<64x40xf32>
      %244 = arith.mulf %243, %243 : vector<64x40xf32>
      %cst_127 = arith.constant dense<0.000000e+00> : vector<40xf32>
      %245 = vector.multi_reduction <add>, %244, %cst_127 [0] : vector<64x40xf32> to vector<40xf32>
      %246 = vector.shape_cast %245 : vector<40xf32> to vector<1x40xf32>
      %cst_128 = arith.constant 0.0158730168 : f32
      %247 = vector.broadcast %cst_128 : f32 to vector<1x40xf32>
      %248 = arith.mulf %246, %247 : vector<1x40xf32>
      %249 = vector.shape_cast %217 : vector<1x1xi1> to vector<1x1xi1>
      %250 = vector.broadcast %249 : vector<1x1xi1> to vector<1x40xi1>
      %251 = arith.select %250, %241, %32 : vector<1x40xi1>, vector<1x40xf32>
      %c0_129 = arith.constant 0 : index
      %c0_130 = arith.constant 0 : index
      %252 = vector.load %arg19[%c0_129, %c0_130] : memref<1x40xf32, #tpu.memory_space<vmem>>, vector<1x40xf32>
      tpu.vector_store %arg19[%c0_129, %c0_130], %251 {strides = array<i32>} : memref<1x40xf32, #tpu.memory_space<vmem>>, vector<1x40xf32>,
      %253 = math.sqrt %248 : vector<1x40xf32>
      %254 = vector.shape_cast %217 : vector<1x1xi1> to vector<1x1xi1>
      %255 = vector.broadcast %254 : vector<1x1xi1> to vector<1x40xi1>
      %256 = arith.select %255, %253, %33 : vector<1x40xi1>, vector<1x40xf32>
      %c0_131 = arith.constant 0 : index
      %c0_132 = arith.constant 0 : index
      %257 = vector.load %arg20[%c0_131, %c0_132] : memref<1x40xf32, #tpu.memory_space<vmem>>, vector<1x40xf32>
      tpu.vector_store %arg20[%c0_131, %c0_132], %256 {strides = array<i32>} : memref<1x40xf32, #tpu.memory_space<vmem>>, vector<1x40xf32>,
      %258 = arith.addf %155, %216 : vector<1x1xf32>
      %259 = arith.extui %217 : vector<1x1xi1> to vector<1x1xi32>
      %260 = arith.sitofp %259 : vector<1x1xi32> to vector<1x1xf32>
      %cst_133 = arith.constant 0.000000e+00 : f32
      %261 = vector.broadcast %cst_133 : f32 to vector<1x128xf32>
      %c0_i32_134 = arith.constant 0 : i32
      %262 = vector.broadcast %c0_i32_134 : i32 to vector<1x128xi32>
      %263 = arith.cmpi eq, %26, %262 : vector<1x128xi32>
      %264 = vector.shape_cast %258 : vector<1x1xf32> to vector<1x1xf32>
      %265 = vector.broadcast %264 : vector<1x1xf32> to vector<1x128xf32>
      %266 = arith.select %263, %265, %261 : vector<1x128xi1>, vector<1x128xf32>
      %c1_i32_135 = arith.constant 1 : i32
      %267 = vector.broadcast %c1_i32_135 : i32 to vector<1x128xi32>
      %268 = arith.cmpi eq, %26, %267 : vector<1x128xi32>
      %269 = vector.shape_cast %73 : vector<1x1xf32> to vector<1x1xf32>
      %270 = vector.broadcast %269 : vector<1x1xf32> to vector<1x128xf32>
      %271 = arith.select %268, %270, %266 : vector<1x128xi1>, vector<1x128xf32>
      %c2_i32 = arith.constant 2 : i32
      %272 = vector.broadcast %c2_i32 : i32 to vector<1x128xi32>
      %273 = arith.cmpi eq, %26, %272 : vector<1x128xi32>
      %274 = vector.shape_cast %155 : vector<1x1xf32> to vector<1x1xf32>
      %275 = vector.broadcast %274 : vector<1x1xf32> to vector<1x128xf32>
      %276 = arith.select %273, %275, %271 : vector<1x128xi1>, vector<1x128xf32>
      %c3_i32 = arith.constant 3 : i32
      %277 = vector.broadcast %c3_i32 : i32 to vector<1x128xi32>
      %278 = arith.cmpi eq, %26, %277 : vector<1x128xi32>
      %279 = vector.shape_cast %216 : vector<1x1xf32> to vector<1x1xf32>
      %280 = vector.broadcast %279 : vector<1x1xf32> to vector<1x128xf32>
      %281 = arith.select %278, %280, %276 : vector<1x128xi1>, vector<1x128xf32>
      %c4_i32 = arith.constant 4 : i32
      %282 = vector.broadcast %c4_i32 : i32 to vector<1x128xi32>
      %283 = arith.cmpi eq, %26, %282 : vector<1x128xi32>
      %284 = vector.shape_cast %150 : vector<1x1xf32> to vector<1x1xf32>
      %285 = vector.broadcast %284 : vector<1x1xf32> to vector<1x128xf32>
      %286 = arith.select %283, %285, %281 : vector<1x128xi1>, vector<1x128xf32>
      %c5_i32 = arith.constant 5 : i32
      %287 = vector.broadcast %c5_i32 : i32 to vector<1x128xi32>
      %288 = arith.cmpi eq, %26, %287 : vector<1x128xi32>
      %289 = vector.shape_cast %182 : vector<1x1xf32> to vector<1x1xf32>
      %290 = vector.broadcast %289 : vector<1x1xf32> to vector<1x128xf32>
      %291 = arith.select %288, %290, %286 : vector<1x128xi1>, vector<1x128xf32>
      %c6_i32 = arith.constant 6 : i32
      %292 = vector.broadcast %c6_i32 : i32 to vector<1x128xi32>
      %293 = arith.cmpi eq, %26, %292 : vector<1x128xi32>
      %294 = vector.shape_cast %188 : vector<1x1xf32> to vector<1x1xf32>
      %295 = vector.broadcast %294 : vector<1x1xf32> to vector<1x128xf32>
      %296 = arith.select %293, %295, %291 : vector<1x128xi1>, vector<1x128xf32>
      %c7_i32 = arith.constant 7 : i32
      %297 = vector.broadcast %c7_i32 : i32 to vector<1x128xi32>
      %298 = arith.cmpi eq, %26, %297 : vector<1x128xi32>
      %299 = vector.shape_cast %260 : vector<1x1xf32> to vector<1x1xf32>
      %300 = vector.broadcast %299 : vector<1x1xf32> to vector<1x128xf32>
      %301 = arith.select %298, %300, %296 : vector<1x128xi1>, vector<1x128xf32>
      %302 = arith.index_cast %29 : i32 to index
      %c0_136 = arith.constant 0 : index
      %303 = vector.load %arg24[%302, %c0_136] : memref<8x128xf32, #tpu.memory_space<vmem>>, vector<1x128xf32>
      tpu.vector_store %arg24[%302, %c0_136], %301 {strides = array<i32>} : memref<8x128xf32, #tpu.memory_space<vmem>>, vector<1x128xf32>,
    }
    %c8_i32_43 = arith.constant 8 : i32
    return
  }
  func.func @transform_0(%arg0: i32) -> (i32, i32) {
    %c0_i32 = arith.constant 0 : i32
    %c0_i32_0 = arith.constant 0 : i32
    %c0_i32_1 = arith.constant 0 : i32
    return %c0_i32, %c0_i32_0 : i32, i32
  }
  func.func @transform_1(%arg0: i32) -> (i32, i32) {
    %c0_i32 = arith.constant 0 : i32
    %c0_i32_0 = arith.constant 0 : i32
    %c0_i32_1 = arith.constant 0 : i32
    return %c0_i32, %c0_i32_0 : i32, i32
  }
  func.func @transform_2(%arg0: i32) -> (i32, i32) {
    %c0_i32 = arith.constant 0 : i32
    %c0_i32_0 = arith.constant 0 : i32
    %c0_i32_1 = arith.constant 0 : i32
    return %c0_i32, %c0_i32_0 : i32, i32
  }
  func.func @transform_3(%arg0: i32) -> (i32, i32) {
    %c0_i32 = arith.constant 0 : i32
    %c0_i32_0 = arith.constant 0 : i32
    %c0_i32_1 = arith.constant 0 : i32
    return %c0_i32, %c0_i32_0 : i32, i32
  }
  func.func @transform_4(%arg0: i32) -> (i32, i32) {
    %c0_i32 = arith.constant 0 : i32
    %c0_i32_0 = arith.constant 0 : i32
    %c0_i32_1 = arith.constant 0 : i32
    return %c0_i32, %c0_i32_0 : i32, i32
  }
  func.func @transform_5(%arg0: i32) -> (i32, i32) {
    %c0_i32 = arith.constant 0 : i32
    %c0_i32_0 = arith.constant 0 : i32
    %c0_i32_1 = arith.constant 0 : i32
    return %c0_i32, %c0_i32_0 : i32, i32
  }
  func.func @transform_6(%arg0: i32) -> (i32, i32) {
    %c0_i32 = arith.constant 0 : i32
    %c0_i32_0 = arith.constant 0 : i32
    %c0_i32_1 = arith.constant 0 : i32
    return %c0_i32, %c0_i32_0 : i32, i32
  }
  func.func @transform_7(%arg0: i32) -> (i32, i32) {
    %c0_i32 = arith.constant 0 : i32
    %c0_i32_0 = arith.constant 0 : i32
    %c0_i32_1 = arith.constant 0 : i32
    return %c0_i32, %c0_i32_0 : i32, i32
  }
  func.func @transform_8(%arg0: i32) -> (i32, i32) {
    %c0_i32 = arith.constant 0 : i32
    %c0_i32_0 = arith.constant 0 : i32
    %c0_i32_1 = arith.constant 0 : i32
    return %c0_i32, %c0_i32_0 : i32, i32
  }
  func.func @transform_9(%arg0: i32) -> (i32, i32) {
    %c0_i32 = arith.constant 0 : i32
    %c0_i32_0 = arith.constant 0 : i32
    %c0_i32_1 = arith.constant 0 : i32
    return %c0_i32, %c0_i32_0 : i32, i32
  }
  func.func @transform_10(%arg0: i32) -> (i32, i32) {
    %c0_i32 = arith.constant 0 : i32
    %c0_i32_0 = arith.constant 0 : i32
    %c0_i32_1 = arith.constant 0 : i32
    return %c0_i32, %c0_i32_0 : i32, i32
  }
  func.func @transform_11(%arg0: i32) -> (i32, i32) {
    %c0_i32 = arith.constant 0 : i32
    %c0_i32_0 = arith.constant 0 : i32
    %c0_i32_1 = arith.constant 0 : i32
    return %c0_i32, %c0_i32_0 : i32, i32
  }
  func.func @transform_12(%arg0: i32) -> (i32, i32) {
    %c0_i32 = arith.constant 0 : i32
    %c0_i32_0 = arith.constant 0 : i32
    %c0_i32_1 = arith.constant 0 : i32
    return %c0_i32, %c0_i32_0 : i32, i32
  }
  func.func @transform_13(%arg0: i32) -> (i32, i32) {
    %c0_i32 = arith.constant 0 : i32
    %c0_i32_0 = arith.constant 0 : i32
    %c0_i32_1 = arith.constant 0 : i32
    return %c0_i32, %c0_i32_0 : i32, i32
  }
  func.func @transform_14(%arg0: i32) -> (i32, i32) {
    %c0_i32 = arith.constant 0 : i32
    %c0_i32_0 = arith.constant 0 : i32
    %c0_i32_1 = arith.constant 0 : i32
    return %c0_i32, %c0_i32_0 : i32, i32
  }
  func.func @transform_15(%arg0: i32) -> (i32, i32) {
    %c0_i32 = arith.constant 0 : i32
    %c0_i32_0 = arith.constant 0 : i32
    %c0_i32_1 = arith.constant 0 : i32
    return %c0_i32, %c0_i32_0 : i32, i32
  }
  func.func @transform_16(%arg0: i32) -> (i32, i32) {
    %c0_i32 = arith.constant 0 : i32
    %c0_i32_0 = arith.constant 0 : i32
    %c0_i32_1 = arith.constant 0 : i32
    return %c0_i32, %c0_i32_0 : i32, i32
  }
  func.func @transform_17(%arg0: i32) -> (i32, i32) {
    %c0_i32 = arith.constant 0 : i32
    %c0_i32_0 = arith.constant 0 : i32
    %c0_i32_1 = arith.constant 0 : i32
    return %c0_i32, %c0_i32_0 : i32, i32
  }
  func.func @transform_18(%arg0: i32) -> (i32, i32) {
    %c0_i32 = arith.constant 0 : i32
    %c0_i32_0 = arith.constant 0 : i32
    %c0_i32_1 = arith.constant 0 : i32
    return %c0_i32, %c0_i32_0 : i32, i32
  }
  func.func @transform_19(%arg0: i32) -> (i32, i32) {
    %c0_i32 = arith.constant 0 : i32
    %c0_i32_0 = arith.constant 0 : i32
    %c0_i32_1 = arith.constant 0 : i32
    return %c0_i32, %c0_i32_0 : i32, i32
  }
  func.func @transform_20(%arg0: i32) -> (i32, i32) {
    %c0_i32 = arith.constant 0 : i32
    %c0_i32_0 = arith.constant 0 : i32
    %c0_i32_1 = arith.constant 0 : i32
    return %c0_i32, %c0_i32_0 : i32, i32
  }
  func.func @transform_21(%arg0: i32) -> (i32, i32) {
    %c0_i32 = arith.constant 0 : i32
    %c0_i32_0 = arith.constant 0 : i32
    %c0_i32_1 = arith.constant 0 : i32
    return %c0_i32, %c0_i32_0 : i32, i32
  }
  func.func @transform_22(%arg0: i32) -> (i32, i32) {
    %c0_i32 = arith.constant 0 : i32
    %c0_i32_0 = arith.constant 0 : i32
    %c0_i32_1 = arith.constant 0 : i32
    return %c0_i32, %c0_i32_0 : i32, i32
  }
  func.func @transform_23(%arg0: i32) -> (i32, i32) {
    %c0_i32 = arith.constant 0 : i32
    %c0_i32_0 = arith.constant 0 : i32
    %c0_i32_1 = arith.constant 0 : i32
    return %c0_i32, %c0_i32_0 : i32, i32
  }
}

</mosaic_0001>

<bundles_post_ra>
// kernel: adpstream_forward_chunk.1
= control target key start
LH: loop header
LB: loop body
LE: loop exit
PB: predicated region body
PF: predicated region fallthrough
CT: control target
= control target key end

     0   :  { %s1355_s0 = inlined_call_operand.vmem [shape: f32[8,40], index: 0, kind: input, shape index: {}]   ;;  %s1356_s1 = inlined_call_operand.vmem [shape: f32[1,40], index: 1, kind: input, shape index: {}, may-alias: {1,18}]   ;;  %s1357_s2 = inlined_call_operand.vmem [shape: f32[1,40], index: 2, kind: input, shape index: {}, may-alias: {2,19}]   ;;  %s1358_s3 = inlined_call_operand.vmem [shape: f32[8,40], index: 3, kind: input, shape index: {}]   ;;  %s1359_s4 = inlined_call_operand.vmem [shape: f32[8,1], index: 4, kind: input, shape index: {}]   ;;  %s1360_s5 = inlined_call_operand.vmem [shape: f32[8,32], index: 5, kind: input, shape index: {}]   ;;  %s1361_s6 = inlined_call_operand.vmem [shape: f32[1,32], index: 6, kind: input, shape index: {}]   ;;  %s1362_s7 = inlined_call_operand.vmem [shape: f32[8,32], index: 7, kind: input, shape index: {}]   ;;  %s1363_s8 = inlined_call_operand.vmem [shape: f32[8,1], index: 8, kind: input, shape index: {}]   ;;  %s1364_s9 = inlined_call_operand.vmem [shape: f32[8,40], index: 9, kind: input, shape index: {}]   ;;  %s1365_s10 = inlined_call_operand.vmem [shape: f32[1,40], index: 10, kind: input, shape index: {}]   ;;  %s1366_s11 = inlined_call_operand.vmem [shape: f32[8,64], index: 11, kind: input, shape index: {}, may-alias: {11,16}]   ;;  %s1367_s12 = inlined_call_operand.vmem [shape: f32[64,40], index: 12, kind: input, shape index: {}, may-alias: {12,17}]   ;;  %s1368_s13 = inlined_call_operand.vmem [shape: f32[1,50], index: 13, kind: input, shape index: {}, may-alias: {13,20}]   ;;  %s1369_s14 = inlined_call_operand.<no memory space> [shape: s32[1,1], index: 14, kind: input, shape index: {}, may-alias: {14,21}]   ;;  %s1370_s16 = inlined_call_operand.vmem [shape: f32[8,64], index: 16, kind: output, shape index: {0}, may-alias: {11,16}]   ;;  %s1371_s17 = inlined_call_operand.vmem [shape: f32[64,40], index: 17, kind: output, shape index: {1}, may-alias: {12,17}]   ;;  %s1372_s18 = inlined_call_operand.vmem [shape: f32[1,40], index: 18, kind: output, shape index: {2}, may-alias: {1,18}]   ;;  %s1373_s19 = inlined_call_operand.vmem [shape: f32[1,40], index: 19, kind: output, shape index: {3}, may-alias: {2,19}]   ;;  %s1374_s20 = inlined_call_operand.vmem [shape: f32[1,50], index: 20, kind: output, shape index: {4}, may-alias: {13,20}]   ;;  %s1375_s21 = inlined_call_operand.hbm [shape: s32[1,1], index: 21, kind: output, shape index: {5}, may-alias: {14,21}]   ;;  %s1376_s22 = inlined_call_operand.hbm [shape: s32[1,1], index: 22, kind: output, shape index: {6}, may-alias: {15,22}]   ;;  %s1377_s23 = inlined_call_operand.vmem [shape: f32[8,128], index: 23, kind: output, shape index: {7}]   ;;  %s1378_s15 = inlined_call_operand.<no memory space> [shape: s32[1,1], index: 15, kind: input, shape index: {}, may-alias: {15,22}]  }
   0x1   :  { %1380 = sst [smem:[#allocation10_spill]] %s1355_s0  ;;  %v29_v0 = vstv %s1369_s14  ;;  %v31_v1 = vstv %s1378_s15 }
   0x2   :  { %1381 = sst [smem:[#allocation11_spill]] %s1356_s1  ;;  %30 = vst [vmem:[#allocation2] sm:$0x1] %v29_v0  ;;  %32 = vst [vmem:[#allocation3] sm:$0x1] %v31_v1 }
   0x3   :  { %1382 = sst [smem:[#allocation12_spill]] %s1357_s2 }
   0x4   :  { %1383 = sst [smem:[#allocation13_spill]] %s1358_s3 }
   0x5   :  { %1384 = sst [smem:[#allocation14_spill]] %s1359_s4 }
   0x6   :  { %1385 = sst [smem:[#allocation15_spill]] %s1360_s5 }
   0x7   :  { %1386 = sst [smem:[#allocation16_spill]] %s1361_s6 }
   0x8   :  { %1387 = sst [smem:[#allocation17_spill]] %s1362_s7 }
   0x9   :  { %33 = vsyncpa [#allocation5], 0 }
   0xa   :  { %34 = vsyncpa [#allocation7], 0  ;;  %v67_v2 = vld [vmem:[%s1366_s11] sm:$0xff]  ;;  %vm68_vm0 = vcmask 523264   ;;  %vm78_vm1 = vcmask 326656   ;;  %v108_v4 = vlaneseq  ;;  %vm88_vm2 = vcmask 319488  }
   0xb   :  { %v70_v3 = vld [vmem:[%s1367_s12] sm:$0xff]  ;;  %69 = vst.msk [vmem:[%s1370_s16] sm:$0xff] %vm68_vm0, %v67_v2  ;;  %vm93_vm3 = vcmask 401408   ;;  %vm1379_vm4 = vcmask 0   ;;  %s1388_s5 = sld [smem:[#allocation11_spill]]  ;;  %s1389_s2 = sld [smem:[#allocation12_spill]] }
   0xc   :  { %79 = vst.msk [vmem:[%s1371_s17] sm:$0xff] %vm78_vm1, %v70_v3  ;;  %v880_v11 = vand.u32 127, %v108_v4  ;;  %v882_v12 = vshrl.u32 %v108_v4, 7  ;;  %v92_v16 = vld [vmem:[%s1368_s13] sm:$0x1]  ;;  %s1390_s30 = sld [smem:[#allocation13_spill]] }
   0xd   :  { %v95_v17 = vld [vmem:[#allocation2] sm:$0x1]  ;;  %v98_v18 = vld [vmem:[#allocation3] sm:$0x1]  ;;  %94 = vst.msk [vmem:[%s1374_s20] sm:$0x1] %vm93_vm3, %v92_v16 }
   0xe   :  { %v110_v19 = vcvt.s32.f32 %v880_v11  ;;  %97 = vst.msk [vmem:[#allocation4] sm:$0x1] %vm1379_vm4, %v95_v17  ;;  %99 = vst.msk [vmem:[#allocation6] sm:$0x1] %vm1379_vm4, %v98_v18  ;;  %s1391_s25 = sld [smem:[#allocation14_spill]]  ;;  %s1392_s26 = sld [smem:[#allocation15_spill]] }
   0xf   :  { %v943_v23 = vadd.s32 8, %v882_v12  ;;  %v946_v24 = vadd.s32 16, %v882_v12  ;;  %v949_v25 = vadd.s32 24, %v882_v12  ;;  %s1393_s6 = sld [smem:[#allocation16_spill]]  ;;  %v964_v28 = vld [vmem:[%s1363_s8] sm:$0xff]  ;;  %v967_v29 = vadd.s32 32, %v882_v12 }
  0x10   :  { %v970_v30 = vadd.s32 40, %v882_v12  ;;  %v975_v31 = vld [vmem:[%s1364_s9] sm:$0xff]  ;;  %v983_v33 = vadd.s32 48, %v882_v12  ;;  %v986_v34 = vadd.s32 56, %v882_v12  ;;  %s988_s8 = smov 0  }
  0x11   :  { %v87_v14 = vld [vmem:[%s1388_s5] sm:$0x1] }
  0x12   :  { %v90_v15 = vld [vmem:[%s1389_s2] sm:$0x1]  ;;  %89 = vst.msk [vmem:[%s1372_s18] sm:$0x1] %vm88_vm2, %v87_v14 }
  0x13   :  { %v71_v5 = vld [vmem:[%s1367_s12 + $0x8] sm:$0xff]  ;;  %v72_v6 = vld [vmem:[%s1367_s12 + $0x10] sm:$0xff]  ;;  %v73_v7 = vld [vmem:[%s1367_s12 + $0x18] sm:$0xff]  ;;  %91 = vst.msk [vmem:[%s1373_s19] sm:$0x1] %vm88_vm2, %v90_v15 }
  0x14   :  { %80 = vst.msk [vmem:[%s1371_s17 + $0x8] sm:$0xff] %vm78_vm1, %v71_v5  ;;  %81 = vst.msk [vmem:[%s1371_s17 + $0x10] sm:$0xff] %vm78_vm1, %v72_v6  ;;  %v930_v20 = vld [vmem:[%s1390_s30] sm:$0xff] }
  0x15   :  { %82 = vst.msk [vmem:[%s1371_s17 + $0x18] sm:$0xff] %vm78_vm1, %v73_v7  ;;  %v935_v21 = vld [vmem:[%s1391_s25] sm:$0xff] }
  0x16   :  { %v940_v22 = vld [vmem:[%s1392_s26] sm:$0xff] }
  0x17   :  { %v954_v26 = vld [vmem:[%s1393_s6] sm:$0x1] }
  0x18   :  { %v980_v32 = vld [vmem:[%s1365_s10] sm:$0x1] }
  0x1c   :  { %v74_v8 = vld [vmem:[%s1367_s12 + $0x20] sm:$0xff]  ;;  %v75_v9 = vld [vmem:[%s1367_s12 + $0x28] sm:$0xff]  ;;  %v76_v10 = vld [vmem:[%s1367_s12 + $0x30] sm:$0xff] }
  0x1d   :  { %83 = vst.msk [vmem:[%s1371_s17 + $0x20] sm:$0xff] %vm78_vm1, %v74_v8  ;;  %84 = vst.msk [vmem:[%s1371_s17 + $0x28] sm:$0xff] %vm78_vm1, %v75_v9 }
  0x1e   :  { %85 = vst.msk [vmem:[%s1371_s17 + $0x30] sm:$0xff] %vm78_vm1, %v76_v10 }
  0x25   :  { %v77_v13 = vld [vmem:[%s1367_s12 + $0x38] sm:$0xff]  ;;  %s1394_s12 = sld [smem:[#allocation17_spill]] }
  0x26   :  { %86 = vst.msk [vmem:[%s1371_s17 + $0x38] sm:$0xff] %vm78_vm1, %v77_v13 }
  0x2b   :  { %v959_v27 = vld [vmem:[%s1394_s12] sm:$0xff] }
  0x2c LB: > { %v996_v35 = vld [vmem:[%s1373_s19] sm:$0x1]  ;;  %s1395_s24 = sld [smem:[#allocation10_spill]]  ;;  %v1014_v41 = vsub.s32 0, %v882_v12  ;;  %v706_v47 = vmov 0   ;;  %vm1396_vm4 = vcmask 0   ;;  %s549_s25 = scalar_lea.vmem %s1377_s23, %s704_s8  ;;  %s704_s8 = sphi %s988_s8, %s125_s8  }
  0x2d   : > { %vm139_vm5 = vcmp.eq.f32.partialorder %v996_v35, 0.0  ;;  %v1009_v38 = vld [vmem:[%s1372_s18] sm:$0x1]  ;;  %628 = vset.pattern.permute.xlu0 %v706_v47  ;;  %629 = vset.pattern.permute.xlu1 %v706_v47  ;;  %v204_v48 = vld [vmem:[#allocation4] sm:$0x1]  ;;  %vm163_vm8 = vcmask 261120  }
  0x2e   : > { %v141_v36 = vsel %vm139_vm5, 1.0, %v996_v35  ;;  %v297_v49 = vadd.s32 1, %v204_v48  ;;  %vm206_vm7 = vcmp.lt.s32.totalorder %v204_v48, 50  ;;  %v1037_v8 = vld [vmem:[%s1370_s16] sm:$0xff] }
  0x2f   : > { %630 = vrcp.f32 %v141_v36  ;;  %v1026_v54 = vsel %vm206_vm7, %v204_v48, 50 }
  0x30   : > { %vm298_vm6 = vcmp.lt.s32.totalorder %v297_v49, 50 }
  0x31   : > { %v299_v50 = vsel %vm298_vm6, %v297_v49, 50 }
  0x32   : > { %s126_s13 = scalar_lea.vmem %s1395_s24, %s704_s8  ;;  %300 = vst.msk [vmem:[#allocation4] sm:$0x1] %vm1396_vm4, %v299_v50  ;;  %s125_s8 = sadd.s32 1, %s704_s8  }
  0x33   : > { %v1004_v37 = vld [vmem:[%s126_s13] sm:$0x1]  ;;  %p122_p0 = scmp.ge.s32.totalorder %s125_s8, 8  }
  0x34   : > { %v140_v39 = vsub.f32 %v1004_v37, %v1009_v38  ;;  %s708_s14 = smov (%p122_p0), [#allocation4]   ;;  %s709_s15 = smov (%p122_p0), [#allocation6]  }
  0x35   :  { %s567_s6 = sshll.u32 (%p122_p0), %s708_s14, 4  ;;  %s577_s27 = sshll.u32 (%p122_p0), %s709_s15, 4  ;;  %s568_s6 = int_to_ptr.vmem [resolvable:$true] %s567_s6  ;;  %s578_s27 = int_to_ptr.vmem [resolvable:$true] %s577_s27 }
  0x36   :  { %s650_s12 = scalar_lea.vmem (%p122_p0), %s568_s6, 16  ;;  %s654_s7 = scalar_lea.vmem (%p122_p0), %s568_s6, 32 }
  0x37   :  { %p651_p1 = scmp.ne.s32.totalorder (%p122_p0), %s568_s6, %s650_s12  ;;  %p655_p2 = scmp.lt.s32.totalorder (%p122_p0), %s568_s6, %s568_s6 }
  0x38   :  { %p656_p3 = scmp.lt.s32.totalorder (%p122_p0), %s654_s7, %s650_s12 }
  0x39   : > { %v631_v40 = vpop.eup %630 }
  0x3a   : > { %v143_v42 = vmul.f32 %v631_v40, %v140_v39  ;;  %p657_p4 = por (%p122_p0), %p656_p3, %p655_p2 }
  0x3c   : > { %v1016_v43 = vsel %vm139_vm5, 0.0, %v143_v42  ;;  %p658_p5 = pnand (%p122_p0), %p657_p4, %p651_p1 }
  0x3d   : > { %v149_v44 = vrot.slane %v1016_v43, %v1014_v41 }
  0x3f   : > { %v151_v45 = vmul.f32 %v149_v44, %v930_v20 }
  0x41   : > { %v152_v46 = vsel %vm78_vm1, %v151_v45, 0.0  ;;  %v1053_v45 = vld [vmem:[%s1374_s20] sm:$0x1] }
  0x42   : > { %153 = vadd.xlane.f32.xlu0 %v152_v46 }
  0xcf   : > { %v154_v51 = vpop.xlane.xlu0 %153 }
  0xd0   : > { %v155_v52 = vadd.f32 %v154_v51, %v935_v21 }
  0xd2   : > { %632 = vtanh.f32 %v155_v52 }
  0xdc   : > { %v633_v53 = vpop.eup %632 }
  0xdd   : > { %159 = vperm.xlu0 %628, %v633_v53  }
  0xe1   : > { %210 = vperm.xlu0 %628, %v1026_v54  }
 0x15c   : > { %v160_v55 = vpop.permute.xlu0 %159 }
 0x15d   : > { %v162_v56 = vmul.f32 %v160_v55, %v940_v22 }
 0x15f   : > { %v164_v57 = vsel %vm163_vm8, %v162_v56, 0.0  ;;  %v208_v56 = vcvt.s32.f32 %v1026_v54 }
 0x160   : > { %v165_v58 = vrot.slane %v164_v57, 4  ;;  %v211_v17 = vpop.permute.xlu0 %210 }
 0x161   : > { %v215_v36 = vrot.slane %v211_v17, %v1014_v41 }
 0x162   : > { %v166_v59 = vadd.f32 %v165_v58, %v164_v57  ;;  %v221_v58 = vmax.f32 %v208_v56, 1.0 }
 0x163   : > { %vm1046_vm9 = vcmp.lt.s32.totalorder %v880_v11, %v215_v36 }
 0x164   : > { %v167_v60 = vrot.slane %v166_v59, 2  ;;  %v217_v48 = vsel %vm1046_vm9, %v1053_v45, 0.0  ;;  %634 = vrcp.f32 %v221_v58 }
 0x165   : > { %v218_v49 = vsel %vm93_vm3, %v217_v48, 0.0 }
 0x166   : > { %v168_v61 = vadd.f32 %v167_v60, %v166_v59 }
 0x168   : > { %v169_v62 = vrot.slane %v168_v61, 1 }
 0x16a   : > { %v170_v63 = vadd.f32 %v169_v62, %v168_v61 }
 0x16c   : > { %v171_v0 = vadd.f32 %v170_v63, %v954_v26 }
 0x16e   : > { %v172_v1 = vmax.f32 %v171_v0, 0.0  ;;  %v635_v61 = vpop.eup %634 }
 0x170   : > { %v176_v2 = vrot.slane %v172_v1, %v1014_v41 }
 0x172   : > { %v177_v3 = vmul.f32 %v176_v2, %v959_v27 }
 0x174   : > { %v178_v4 = vsel %vm163_vm8, %v177_v3, 0.0 }
 0x175   : > { %179 = vadd.xlane.f32.xlu1 %v178_v4 }
 0x202   : > { %v180_v5 = vpop.xlane.xlu1 %179 }
 0x203   : > { %v181_v6 = vadd.f32 %v180_v5, %v964_v28 }
 0x205   : > { %v182_v7 = vadd.f32 %v633_v53, %v181_v6 }
 0x207   : > { %185 = vperm.xlu1 %629, %v182_v7  }
 0x286   : > { %v1039_v9 = vpop.permute.xlu1 %185 }
 0x287   : > { %v305_v10 = vsub.f32 %v1037_v8, %v1039_v9  ;;  %v188_v54 = vmul.f32 %v1039_v9, %v975_v31 }
 0x289   : > { %v306_v13 = vand.u32 2147483647, %v305_v10  ;;  %v189_v0 = vsel %vm78_vm1, %v188_v54, 0.0 }
 0x28a   : > { %v190_v1 = vrot.slane %v189_v0, 4 }
 0x28b   : > { %v307_v14 = vsel %vm68_vm0, %v306_v13, 0.0 }
 0x28c   : > { %v308_v15 = vrot.slane %v307_v14, 4  ;;  %v191_v2 = vadd.f32 %v190_v1, %v189_v0 }
 0x28e   : > { %v309_v16 = vadd.f32 %v308_v15, %v307_v14  ;;  %v192_v3 = vrot.slane %v191_v2, 2 }
 0x290   : > { %v310_v18 = vrot.slane %v309_v16, 2  ;;  %v193_v4 = vadd.f32 %v192_v3, %v191_v2 }
 0x292   : > { %v311_v39 = vadd.f32 %v310_v18, %v309_v16  ;;  %v194_v5 = vrot.slane %v193_v4, 1 }
 0x294   : > { %v312_v40 = vrot.slane %v311_v39, 1  ;;  %v195_v6 = vadd.f32 %v194_v5, %v193_v4 }
 0x296   : > { %v313_v44 = vadd.f32 %v312_v40, %v311_v39  ;;  %v196_v13 = vadd.f32 %v195_v6, %v980_v32 }
 0x298   : > { %v314_v46 = vsel %vm68_vm0, %v313_v44, inf  ;;  %v197_v17 = vsub.f32 %v196_v13, %v1016_v43 }
 0x299   : > { %315 = vmin.xlane.f32.xlu1 %v314_v46  ;;  %v610_v46 = vadd.f32 -1.0, %v208_v56 }
 0x29a   : > { %v198_v40 = vmul.f32 %v197_v17, %v197_v17 }
 0x29b   : > { %v244_v48 = vmax.f32 %v610_v46, 1.0 }
 0x29d   : > { %219 = vadd.xlane.f32.xlu1 %v218_v49  ;;  %636 = vrcp.f32 %v244_v48 }
 0x2a7   : > { %v637_v58 = vpop.eup %636 }
 0x326   : > { %v1060_v50 = vpop.xlane.xlu1 %315 }
 0x327   : > { %vm317_vm10 = vcmp.eq.f32.partialorder %v313_v44, %v1060_v50 }
 0x328   : > { %v318_v51 = vsel %vm317_vm10, %v110_v19, 64.0 }
 0x329   : > { %v319_v52 = vsel %vm68_vm0, %v318_v51, inf }
 0x32a   : > { %320 = vmin.xlane.f32.xlu0 %v319_v52  ;;  %v220_v62 = vpop.xlane.xlu1 %219 }
 0x32b   : > { %v1078_v63 = vmul.f32 %v635_v61, %v220_v62 }
 0x3b7   : > { %v1066_v53 = vpop.xlane.xlu0 %320 }
 0x3b8   : > { %v612_v55 = vtrunc.f32 %v1066_v53 }
 0x3ba   : > { %v1070_v57 = vcvt.f32.s32 %v612_v55 }
 0x3bc   : > { %vm323_vm11 = vcmp.eq.s32.totalorder %v880_v11, %v1070_v57 }
 0x3bd   : > { %v324_v59 = vsel %vm323_vm11, 1e+30, %v313_v44  ;;  %v199_v44 = vsel %vm88_vm2, %v198_v40, 0.0 }
 0x3be   : > { %v325_v60 = vsel %vm68_vm0, %v324_v59, inf }
 0x3bf   : > { %326 = vmin.xlane.f32.xlu1 %v325_v60 }
 0x3d0   : > { %226 = vperm.xlu1 %629, %v1078_v63  }
 0x44c   : > { %v1084_v7 = vpop.xlane.xlu1 %326 }
 0x44d   : > { %vm328_vm12 = vcmp.eq.f32.partialorder %v324_v59, %v1084_v7 }
 0x44e   : > { %v329_v10 = vsel %vm328_vm12, %v110_v19, 64.0 }
 0x44f   : > { %v330_v14 = vsel %vm68_vm0, %v329_v10, inf }
 0x450   : > { %331 = vmin.xlane.f32.xlu1 %v330_v14  ;;  %v227_v15 = vpop.permute.xlu1 %226 }
 0x451   : > { %v229_v16 = vsub.f32 %v1053_v45, %v227_v15 }
 0x453   : > { %v230_v18 = vsel %vm1046_vm9, %v229_v16, 0.0 }
 0x454   : > { %v231_v36 = vmul.f32 %v230_v18, %v230_v18 }
 0x456   : > { %v232_v39 = vsel %vm93_vm3, %v231_v36, 0.0 }
 0x457   : > { %233 = vadd.xlane.f32.xlu0 %v232_v39 }
 0x45b   : > { %200 = vadd.xlane.f32.xlu0 %v199_v44 }
 0x4dd   : > { %v332_v49 = vpop.xlane.xlu1 %331 }
 0x4de   : > { %v614_v51 = vtrunc.f32 %v332_v49 }
 0x4e0   : > { %v615_v52 = vcvt.f32.s32 %v614_v51 }
 0x4e2   : > { %vm334_vm13 = vcmp.eq.s32.totalorder %v880_v11, %v615_v52 }
 0x4e3   : > { %v335_v43 = vsel %vm334_vm13, 1e+30, %v324_v59  ;;  %vm361_vm13 = vcmp.eq.s32.totalorder %v946_v24, %v1070_v57 }
 0x4e4   : > { %v336_v42 = vsel %vm68_vm0, %v335_v43, inf  ;;  %v234_v55 = vpop.xlane.xlu0 %233 }
 0x4e5   : > { %337 = vmin.xlane.f32.xlu0 %v336_v42  ;;  %v235_v60 = vmul.f32 %v635_v61, %v234_v55  ;;  %v246_v62 = vmul.f32 %v637_v58, %v234_v55  ;;  %v1099_v61 = vld [vmem:[#allocation6] sm:$0x1] }
 0x4e6   : > { %v301_v13 = vadd.s32 1, %v1099_v61 }
 0x4e7   : > { %638 = vrsqrt.f32 %v235_v60  ;;  %vm238_vm14 = vcmp.eq.f32.partialorder %v235_v60, inf  ;;  %v241_v3 = vand.u32 2147483648, %v235_v60  ;;  %vm240_vm15 = vcmp.eq.f32.partialorder %v235_v60, 0.0 }
 0x4e8   : > { %640 = vrsqrt.f32 %v246_v62  ;;  %vm249_vm5 = vcmp.eq.f32.partialorder %v246_v62, inf  ;;  %v252_v5 = vand.u32 2147483648, %v246_v62  ;;  %vm251_vm6 = vcmp.eq.f32.partialorder %v246_v62, 0.0  ;;  %v201_v15 = vpop.xlane.xlu0 %200 }
 0x4e9   : > { %vm302_vm8 = vcmp.ge.s32.totalorder %v301_v13, 50  ;;  %v1103_v16 = vmul.f32 0.025, %v201_v15 }
 0x4ea   : > { %v303_v14 = vsel %vm302_vm8, 0, %v301_v13  ;;  %vm360_vm8 = vcmp.eq.s32.totalorder %v943_v23, %v1070_v57 }
 0x4eb   : > { %304 = vst.msk [vmem:[#allocation6] sm:$0x1] %vm1396_vm4, %v303_v14  ;;  %v256_v18 = vsub.f32 %v1103_v16, %v1078_v63 }
 0x4f1   : > { %v639_v54 = vpop.eup %638 }
 0x4f2   : > { %v641_v0 = vpop.eup %640  ;;  %v237_v56 = vmul.f32 %v639_v54, %v235_v60 }
 0x4f3   : > { %v248_v1 = vmul.f32 %v641_v0, %v246_v62 }
 0x4f4   : > { %v239_v2 = vsel %vm238_vm14, %v235_v60, %v237_v56 }
 0x4f5   : > { %v242_v4 = vsel %vm240_vm15, %v241_v3, %v239_v2  ;;  %v250_v59 = vsel %vm249_vm5, %v246_v62, %v248_v1  ;;  %vm359_vm15 = vcmp.eq.s32.totalorder %v882_v12, %v1070_v57 }
 0x4f6   : > { %v253_v6 = vsel %vm251_vm6, %v252_v5, %v250_v59  ;;  %vm254_vm7 = vcmp.gt.f32.partialorder %v242_v4, 0.0  ;;  %v339_v5 = vmul.f32 0.5, %v1084_v7  ;;  %vm366_vm6 = vcmp.eq.s32.totalorder %v986_v34, %v1070_v57 }
 0x4f7   : > { %v255_v10 = vsel %vm254_vm7, %v253_v6, 1.0 }
 0x4f8   : > { %642 = vrcp.f32 %v255_v10  ;;  %v340_v13 = vadd.f32 %v339_v5, %v1060_v50 }
 0x502   : > { %v643_v17 = vpop.eup %642 }
 0x503   : > { %v258_v36 = vmul.f32 %v643_v17, %v256_v18 }
 0x505   : > { %v259_v39 = vmul.f32 0.70710677, %v258_v36 }
 0x507   : > { %v260_v40 = vand.u32 2147483647, %v259_v39  ;;  %vm280_vm9 = vcmp.ge.f32.partialorder %v259_v39, 0.0 }
 0x509   : > { %v261_v44 = vmul.f32 0.3275911, %v260_v40  ;;  %v274_v42 = vmul.f32 %v260_v40, %v260_v40 }
 0x50b   : > { %v262_v46 = vadd.f32 1.0, %v261_v44  ;;  %v275_v58 = vsub.f32 0.0, %v274_v42 }
 0x50d   : > { %644 = vrcp.f32 %v262_v46  ;;  %v276_v62 = vmul.f32 1.442695, %v275_v58 }
 0x50f   : > { %646 = vpow2.f32 %v276_v62  ;;  %v133_v62 = vld [vmem:[%s1371_s17 + $0x10] sm:$0xff] }
 0x517   : > { %v645_v48 = vpop.eup %644 }
 0x518   : > { %v265_v49 = vmul.f32 1.0614054, %v645_v48 }
 0x519   : > { %v647_v56 = vpop.eup %646 }
 0x51a   : > { %v266_v51 = vadd.f32 -1.4531521, %v265_v49 }
 0x51c   : > { %v267_v52 = vmul.f32 %v645_v48, %v266_v51 }
 0x51e   : > { %v268_v43 = vadd.f32 1.4214138, %v267_v52 }
 0x520   : > { %v269_v55 = vmul.f32 %v645_v48, %v268_v43  ;;  %v707_v43 = vmov 0.0  }
 0x522   : > { %v270_v60 = vadd.f32 -0.28449672, %v269_v55 }
 0x524   : > { %v271_v54 = vmul.f32 %v645_v48, %v270_v60 }
 0x526   : > { %v272_v0 = vadd.f32 0.2548296, %v271_v54 }
 0x528   : > { %v273_v63 = vmul.f32 %v645_v48, %v272_v0  ;;  %v131_v0 = vld [vmem:[%s1371_s17] sm:$0xff] }
 0x52a   : > { %v278_v1 = vmul.f32 %v647_v56, %v273_v63 }
 0x52c   : > { %v279_v2 = vsub.f32 1.0, %v278_v1  ;;  %v138_v1 = vld [vmem:[%s1371_s17 + $0x38] sm:$0xff] }
 0x52e   : > { %v281_v3 = vsub.f32 0.0, %v279_v2 }
 0x530   : > { %v282_v4 = vsel %vm280_vm9, %v279_v2, %v281_v3  ;;  %v132_v3 = vld [vmem:[%s1371_s17 + $0x8] sm:$0xff] }
 0x531   : > { %v283_v59 = vadd.f32 1.0, %v282_v4 }
 0x533   : > { %v284_v6 = vmul.f32 0.5, %v283_v59 }
 0x535   : > { %v285_v14 = vsub.f32 1.0, %v284_v6 }
 0x537   : > { %v286_v18 = vmul.f32 %v285_v14, %v1103_v16 }
 0x572   : > { %v338_v10 = vpop.xlane.xlu0 %337 }
 0x573   : > { %v341_v15 = vmul.f32 0.25, %v338_v10 }
 0x575   : > { %v342_v17 = vadd.f32 %v341_v15, %v340_v13  ;;  %v134_v13 = vld [vmem:[%s1371_s17 + $0x18] sm:$0xff] }
 0x577   : > { %v1110_v36 = vmul.f32 0.5714286, %v342_v17 }
 0x579   : > { %vm344_vm10 = vcmp.le.f32.partialorder %v1110_v36, %v286_v18  ;;  %v511_v60 = vadd.f32 %v1110_v36, %v286_v18 }
 0x57a   : > { %v345_v39 = vsel %vm344_vm10, 1, %v706_v47  ;;  %v611_v42 = vsel %vm344_vm10, 1.0, %v707_v43 }
 0x57b   : > { %v370_v40 = vrot.slane %v345_v39, %v1014_v41 }
 0x57d   : > { %vm1117_vm12 = vcmp.eq.s32.totalorder %v370_v40, 1 }
 0x57e   : > { %vm374_vm14 = vmand %vm361_vm13, %vm1117_vm12  ;;  %vm362_vm13 = vcmp.eq.s32.totalorder %v949_v25, %v1070_v57 }
 0x57f   : > { %v382_v44 = vsel %vm374_vm14, 1, %v706_v47  ;;  %vm372_vm5 = vmand %vm359_vm15, %vm1117_vm12  ;;  %vm363_vm15 = vcmp.eq.s32.totalorder %v967_v29, %v1070_v57 }
 0x580   : > { %395 = vperm.xlu1 %629, %v382_v44   ;;  %v380_v46 = vsel %vm372_vm5, 1, %v706_v47  ;;  %vm379_vm7 = vmand %vm366_vm6, %vm1117_vm12  ;;  %vm364_vm6 = vcmp.eq.s32.totalorder %v970_v30, %v1070_v57 }
 0x581   : > { %389 = vperm.xlu0 %628, %v380_v46   ;;  %vm373_vm9 = vmand %vm360_vm8, %vm1117_vm12  ;;  %v387_v48 = vsel %vm379_vm7, 1, %v706_v47 }
 0x582   : > { %vm375_vm14 = vmand %vm362_vm13, %vm1117_vm12  ;;  %v381_v49 = vsel %vm373_vm9, 1, %v706_v47  ;;  %vm365_vm13 = vcmp.eq.s32.totalorder %v983_v33, %v1070_v57  ;;  %v135_v57 = vld [vmem:[%s1371_s17 + $0x20] sm:$0xff] }
 0x583   : > { %vm376_vm5 = vmand %vm363_vm15, %vm1117_vm12  ;;  %v383_v51 = vsel %vm375_vm14, 1, %v706_v47 }
 0x584   : > { %410 = vperm.xlu1 %629, %v387_v48   ;;  %vm377_vm8 = vmand %vm364_vm6, %vm1117_vm12  ;;  %v384_v52 = vsel %vm376_vm5, 1, %v706_v47 }
 0x585   : > { %392 = vperm.xlu0 %628, %v381_v49   ;;  %vm378_vm4 = vmand %vm365_vm13, %vm1117_vm12  ;;  %v385_v55 = vsel %vm377_vm8, 1, %v706_v47 }
 0x586   : > { %v386_v58 = vsel %vm378_vm4, 1, %v706_v47 }
 0x588   : > { %347 = vperm.xlu1 %629, %v345_v39  }
 0x589   : > { %398 = vperm.xlu0 %628, %v383_v51  }
 0x58c   : > { %288 = vperm.xlu1 %629, %v1099_v61   ;;  %v1167_v61 = vrot.slane %v1004_v37, %v1014_v41 }
 0x58d   : > { %401 = vperm.xlu0 %628, %v384_v52  }
 0x590   : > { %545 = vperm.xlu1 %629, %v611_v42  }
 0x591   : > { %404 = vperm.xlu0 %628, %v385_v55  }
 0x595   : > { %407 = vperm.xlu0 %628, %v386_v58   ;;  %v137_v58 = vld [vmem:[%s1371_s17 + $0x30] sm:$0xff] }
 0x599   : > { %516 = vperm.xlu0 %628, %v511_v60  }
 0x59d   : > { %525 = vperm.xlu0 %628, %v286_v18  }
 0x5a1   : > { %534 = vperm.xlu0 %628, %v284_v6  }
 0x5ff   : > { %v396_v54 = vpop.permute.xlu1 %395 }
 0x600   : > { %vm414_vm4 = vcmp.eq.s32.totalorder %v396_v54, 1  ;;  %v390_v63 = vpop.permute.xlu0 %389 }
 0x601   : > { %v1176_v56 = vsel %vm414_vm4, %v1167_v61, %v133_v62  ;;  %vm412_vm10 = vcmp.eq.s32.totalorder %v390_v63, 1  ;;  %vm513_vm4 = vcmp.eq.s32.totalorder %v880_v11, 0 }
 0x602   : > { %434 = vst.msk [vmem:[%s1371_s17 + $0x10] sm:$0xff] %vm78_vm1, %v1176_v56  ;;  %v1184_v37 = vsel %vm412_vm10, %v1167_v61, %v131_v0  ;;  %vm520_vm10 = vcmp.eq.s32.totalorder %v880_v11, 1 }
 0x603   : > { %432 = vst.msk [vmem:[%s1371_s17] sm:$0xff] %vm78_vm1, %v1184_v37  ;;  %v411_v2 = vpop.permute.xlu1 %410  ;;  %v440_v15 = vsel %vm78_vm1, %v1184_v37, 0.0 }
 0x604   : > { %vm419_vm12 = vcmp.eq.s32.totalorder %v411_v2, 1  ;;  %v393_v4 = vpop.permute.xlu0 %392 }
 0x605   : > { %v1198_v59 = vsel %vm419_vm12, %v1167_v61, %v138_v1  ;;  %vm413_vm7 = vcmp.eq.s32.totalorder %v393_v4, 1  ;;  %vm522_vm12 = vcmp.eq.s32.totalorder %v880_v11, 2 }
 0x606   : > { %439 = vst.msk [vmem:[%s1371_s17 + $0x38] sm:$0xff] %vm78_vm1, %v1198_v59  ;;  %v1206_v5 = vsel %vm413_vm7, %v1167_v61, %v132_v3  ;;  %v453_v3 = vsel %vm78_vm1, %v1198_v59, 0.0  ;;  %vm529_vm7 = vcmp.eq.s32.totalorder %v880_v11, 3 }
 0x607   : > { %433 = vst.msk [vmem:[%s1371_s17 + $0x8] sm:$0xff] %vm78_vm1, %v1206_v5  ;;  %v441_v6 = vsel %vm78_vm1, %v1206_v5, 0.0  ;;  %v1215_v10 = vpop.permute.xlu1 %347 }
 0x608   : > { %vm349_vm9 = vcmp.eq.s32.totalorder %v1215_v10, 1  ;;  %v399_v14 = vpop.permute.xlu0 %398  ;;  %v442_v17 = vadd.f32 %v441_v6, %v440_v15 }
 0x609   : > { %vm350_vm14 = vmand %vm323_vm11, %vm349_vm9  ;;  %vm415_vm15 = vcmp.eq.s32.totalorder %v399_v14, 1 }
 0x60a   : > { %v351_v18 = vsel %vm350_vm14, 1, %v706_v47  ;;  %v1230_v39 = vsel %vm415_vm15, %v1167_v61, %v134_v13  ;;  %v443_v47 = vsel %vm78_vm1, %v1176_v56, 0.0  ;;  %vm531_vm14 = vcmp.eq.s32.totalorder %v880_v11, 4 }
 0x60b   : > { %v355_v40 = vrot.slane %v351_v18, %v1014_v41  ;;  %435 = vst.msk [vmem:[%s1371_s17 + $0x18] sm:$0xff] %vm78_vm1, %v1230_v39  ;;  %v289_v7 = vpop.permute.xlu1 %288  ;;  %v444_v49 = vadd.f32 %v443_v47, %v442_v17  ;;  %vm538_vm15 = vcmp.eq.s32.totalorder %v880_v11, 5 }
 0x60c   : > { %v293_v44 = vrot.slane %v289_v7, %v1014_v41  ;;  %v402_v46 = vpop.permute.xlu0 %401  ;;  %v445_v41 = vsel %vm78_vm1, %v1230_v39, 0.0 }
 0x60d   : > { %vm356_vm11 = vcmp.eq.s32.totalorder %v355_v40, 1  ;;  %vm416_vm5 = vcmp.eq.s32.totalorder %v402_v46, 1  ;;  %v446_v42 = vadd.f32 %v445_v41, %v444_v49 }
 0x60e   : > { %v357_v48 = vsel %vm356_vm11, %v1039_v9, %v1037_v8  ;;  %vm294_vm6 = vcmp.eq.s32.totalorder %v880_v11, %v293_v44  ;;  %v428_v51 = vsel %vm416_vm5, %v1167_v61, %v135_v57  ;;  %v136_v8 = vld [vmem:[%s1371_s17 + $0x28] sm:$0xff]  ;;  %vm540_vm11 = vcmp.eq.s32.totalorder %v880_v11, 6 }
 0x60f   : > { %358 = vst.msk [vmem:[%s1370_s16] sm:$0xff] %vm68_vm0, %v357_v48  ;;  %v295_v52 = vsel %vm294_vm6, %v1103_v16, %v1053_v45  ;;  %v447_v43 = vsel %vm78_vm1, %v428_v51, 0.0  ;;  %vm542_vm5 = vcmp.eq.s32.totalorder %v880_v11, 7  ;;  %v546_v46 = vpop.permute.xlu1 %545 }
 0x610   : > { %436 = vst.msk [vmem:[%s1371_s17 + $0x20] sm:$0xff] %vm78_vm1, %v428_v51  ;;  %v405_v9 = vpop.permute.xlu0 %404  ;;  %v448_v60 = vadd.f32 %v447_v43, %v446_v42 }
 0x611   : > { %296 = vst.msk [vmem:[%s1374_s20] sm:$0x1] %vm93_vm3, %v295_v52  ;;  %vm417_vm8 = vcmp.eq.s32.totalorder %v405_v9, 1 }
 0x612   : > { %v429_v45 = vsel %vm417_vm8, %v1167_v61, %v136_v8 }
 0x613   : > { %437 = vst.msk [vmem:[%s1371_s17 + $0x28] sm:$0xff] %vm78_vm1, %v429_v45  ;;  %v449_v55 = vsel %vm78_vm1, %v429_v45, 0.0 }
 0x614   : > { %v408_v62 = vpop.permute.xlu0 %407  ;;  %v450_v54 = vadd.f32 %v449_v55, %v448_v60 }
 0x615   : > { %vm418_vm13 = vcmp.eq.s32.totalorder %v408_v62, 1 }
 0x616   : > { %v430_v0 = vsel %vm418_vm13, %v1167_v61, %v137_v58 }
 0x617   : > { %438 = vst.msk [vmem:[%s1371_s17 + $0x30] sm:$0xff] %vm78_vm1, %v430_v0  ;;  %v451_v63 = vsel %vm78_vm1, %v430_v0, 0.0 }
 0x618   : > { %v452_v1 = vadd.f32 %v451_v63, %v450_v54  ;;  %v517_v2 = vpop.permute.xlu0 %516 }
 0x619   : > { %v519_v4 = vsel %vm513_vm4, %v517_v2, 0.0 }
 0x61a   : > { %v454_v6 = vadd.f32 %v453_v3, %v452_v1  ;;  %v521_v13 = vsel %vm520_vm10, %v1103_v16, %v519_v4 }
 0x61c   : > { %v455_v61 = vrot.slane %v454_v6, 4  ;;  %v526_v14 = vpop.permute.xlu0 %525 }
 0x61d   : > { %v528_v15 = vsel %vm522_vm12, %v526_v14, %v521_v13 }
 0x61e   : > { %v456_v17 = vadd.f32 %v455_v61, %v454_v6  ;;  %v530_v40 = vsel %vm529_vm7, %v1110_v36, %v528_v15 }
 0x620   : > { %v457_v18 = vrot.slane %v456_v17, 2  ;;  %v535_v7 = vpop.permute.xlu0 %534 }
 0x621   : > { %v537_v57 = vsel %vm531_vm14, %v535_v7, %v530_v40 }
 0x622   : > { %v458_v16 = vadd.f32 %v457_v18, %v456_v17  ;;  %v539_v44 = vsel %vm538_vm15, %v1060_v50, %v537_v57 }
 0x623   : > { %v541_v47 = vsel %vm540_vm11, %v1066_v53, %v539_v44 }
 0x624   : > { %v459_v48 = vrot.slane %v458_v16, 1  ;;  %v548_v49 = vsel %vm542_vm5, %v546_v46, %v541_v47 }
 0x625   : > { %550 = vst [vmem:[%s549_s25] sm:$0x1] %v548_v49 }
 0x626   : > { %v460_v36 = vadd.f32 %v459_v48, %v458_v16 }
 0x628   : > { %v461_v41 = vmul.f32 0.015625, %v460_v36 }
 0x62a   : > { %v462_v52 = vsub.f32 %v1184_v37, %v461_v41  ;;  %v463_v8 = vsub.f32 %v1206_v5, %v461_v41  ;;  %v464_v9 = vsub.f32 %v1176_v56, %v461_v41  ;;  %v465_v43 = vsub.f32 %v1230_v39, %v461_v41 }
 0x62b   : > { %v466_v42 = vsub.f32 %v428_v51, %v461_v41  ;;  %v467_v60 = vsub.f32 %v429_v45, %v461_v41  ;;  %v468_v1 = vsub.f32 %v430_v0, %v461_v41  ;;  %v500_v56 = vsel %vm349_vm9, %v461_v41, %v1009_v38 }
 0x62c   : > { %v470_v55 = vmul.f32 %v462_v52, %v462_v52  ;;  %v471_v58 = vmul.f32 %v463_v8, %v463_v8  ;;  %v472_v50 = vmul.f32 %v464_v9, %v464_v9  ;;  %v473_v62 = vmul.f32 %v465_v43, %v465_v43  ;;  %501 = vst.msk [vmem:[%s1372_s18] sm:$0x1] %vm88_vm2, %v500_v56 }
 0x62d   : > { %v474_v2 = vmul.f32 %v466_v42, %v466_v42  ;;  %v469_v39 = vsub.f32 %v1198_v59, %v461_v41  ;;  %v475_v51 = vmul.f32 %v467_v60, %v467_v60  ;;  %v476_v0 = vmul.f32 %v468_v1, %v468_v1 }
 0x62e   : > { %v478_v53 = vsel %vm78_vm1, %v470_v55, 0.0  ;;  %v479_v54 = vsel %vm78_vm1, %v471_v58, 0.0  ;;  %v481_v37 = vsel %vm78_vm1, %v472_v50, 0.0  ;;  %v483_v45 = vsel %vm78_vm1, %v473_v62, 0.0 }
 0x62f   : > { %v480_v63 = vadd.f32 %v479_v54, %v478_v53  ;;  %v485_v4 = vsel %vm78_vm1, %v474_v2, 0.0  ;;  %v477_v61 = vmul.f32 %v469_v39, %v469_v39  ;;  %v487_v13 = vsel %vm78_vm1, %v475_v51, 0.0 }
 0x630   : > { %v489_v14 = vsel %vm78_vm1, %v476_v0, 0.0 }
 0x631   : > { %v482_v5 = vadd.f32 %v481_v37, %v480_v63  ;;  %v491_v17 = vsel %vm78_vm1, %v477_v61, 0.0 }
 0x633   : > { %v484_v3 = vadd.f32 %v483_v45, %v482_v5 }
 0x635   : > { %v486_v6 = vadd.f32 %v485_v4, %v484_v3 }
 0x637   : > { %v488_v38 = vadd.f32 %v487_v13, %v486_v6 }
 0x639   : > { %v490_v15 = vadd.f32 %v489_v14, %v488_v38 }
 0x63b   : > { %v492_v18 = vadd.f32 %v491_v17, %v490_v15 }
 0x63d   : > { %v493_v40 = vrot.slane %v492_v18, 4 }
 0x63f   : > { %v494_v59 = vadd.f32 %v493_v40, %v492_v18 }
 0x641   : > { %v495_v7 = vrot.slane %v494_v59, 2 }
 0x643   : > { %v496_v57 = vadd.f32 %v495_v7, %v494_v59 }
 0x645   : > { %v497_v16 = vrot.slane %v496_v57, 1 }
 0x647   : > { %v498_v44 = vadd.f32 %v497_v16, %v496_v57 }
 0x649   : > { %v499_v46 = vmul.f32 0.015873017, %v498_v44 }
 0x64b   : > { %648 = vrsqrt.f32 %v499_v46  ;;  %vm504_vm6 = vcmp.eq.f32.partialorder %v499_v46, inf  ;;  %v507_v49 = vand.u32 2147483648, %v499_v46  ;;  %vm506_vm8 = vcmp.eq.f32.partialorder %v499_v46, 0.0 }
 0x655   : > { %v649_v47 = vpop.eup %648  ;;  %124 = sbr.rel (!%p122_p0) target bundleno = 44 (0x2c), region = 149 }
 0x656   : > { %v503_v48 = vmul.f32 %v649_v47, %v499_v46 }
 0x658   : > { %v505_v36 = vsel %vm504_vm6, %v499_v46, %v503_v48 }
 0x659   : > { %v508_v41 = vsel %vm506_vm8, %v507_v49, %v505_v36 }
 0x65a   : > { %v509_v52 = vsel %vm349_vm9, %v508_v41, %v996_v35 }
 0x65b   : > { %510 = vst.msk [vmem:[%s1373_s19] sm:$0x1] %vm88_vm2, %v509_v52 }
 0x65c   :  { %661 = shalt.err (!%p658_p5)
}
 0x65d   :  { %s662_s29 = scalar_lea.hbm %s1375_s21, 16 }
 0x65e   :  { %p663_p6 = scmp.ne.s32.totalorder %s1375_s21, %s662_s29  ;;  %p666_p7 = scmp.lt.u32.totalorder %s662_s29, %s1375_s21 }
 0x660   :  { %p668_p8 = pnand %p666_p7, %p663_p6 }
 0x662   :  { %671 = shalt.err (!%p668_p8)
}
 0x663   :  { %570 = dma.vmem_to_hbm [thread:$0]  %s568_s6, 16, %s1375_s21, [#allocation5]  }
 0x664   :  { %s672_s20 = scalar_lea.vmem %s578_s27, 16  ;;  %s676_s23 = scalar_lea.vmem %s578_s27, 32 }
 0x665   :  { %p673_p9 = scmp.ne.s32.totalorder %s578_s27, %s672_s20  ;;  %p677_p10 = scmp.lt.s32.totalorder %s578_s27, %s578_s27 }
 0x666   :  { %p678_p11 = scmp.lt.s32.totalorder %s676_s23, %s672_s20 }
 0x668   :  { %p679_p12 = por %p678_p11, %p677_p10 }
 0x66a   :  { %p680_p13 = pnand %p679_p12, %p673_p9 }
 0x66c   :  { %683 = shalt.err (!%p680_p13)
}
 0x66d   :  { %s684_s4 = scalar_lea.hbm %s1376_s22, 16 }
 0x66e   :  { %p685_p0 = scmp.ne.s32.totalorder %s1376_s22, %s684_s4  ;;  %p688_p1 = scmp.lt.u32.totalorder %s684_s4, %s1376_s22 }
 0x670   :  { %p690_p2 = pnand %p688_p1, %p685_p0 }
 0x672   :  { %693 = shalt.err (!%p690_p2)
}
 0x673   :  { %580 = dma.vmem_to_hbm [thread:$0]  %s578_s27, 16, %s1376_s22, [#allocation7]  }
 0x674   :  { %698 = dma.done.wait [#allocation5], 16  }
 0x675   :  { %699 = vsyncadd [#allocation5], 4294967280 }
 0x676   :  { %700 = dma.done.wait [#allocation7], 16  }
 0x677   :  { %701 = vsyncadd [#allocation7], 4294967280 }
 0x678   :  { %601 = vsyncpa [#allocation5], 1 }
 0x679   :  { %602 = vsyncpa [#allocation7], 1 }

</bundles_post_ra>
